<compile_context>
chip_gen: v5e
topology: v5e:2x2
jax: 0.10.0
libtpu: 0.0.40
codegen_flags: <defaults>
</compile_context>

<pallas_src>
import math

import jax
import jax.numpy as jnp
from jax.experimental import pallas as pl
from jax.experimental.pallas import tpu as pltpu

# ---- model config (small, consistent with the module) ----
B = 2            # batch
S = 8            # sequence length
D = 32           # config.dim
N_HEADS = 4      # config.n_heads
HEAD_DIM = D // N_HEADS
HD2 = HEAD_DIM // 2
HIDDEN = 2 * D   # FFN hidden dim
ROWS = B * S     # flattened token rows per kernel invocation
EPS = 1e-5
NEG_INF = -1e30
SCALE = 1.0 / math.sqrt(HEAD_DIM)

# ---- packed constant-slab layout (all row starts 8-sublane aligned) ----
CW = 5 * D                         # 160 lanes: widest row group is [wq|wk|wv|wq_rot|wk_rot]
ROW_WPROJ = 0                      # (D, 5D)   fused, LN-gamma-folded QKV + rotated-QK proj
ROW_WO = ROW_WPROJ + D             # (D, D)    attention output projection
ROW_W13 = ROW_WO + D               # (D, 2*H)  fused, LN-gamma-folded gate/up projection
ROW_W2 = ROW_W13 + D               # (H, D)    FFN down projection
ROW_BIAS1 = ROW_W2 + HIDDEN        # (1, 5D)   folded LN beta for the QKV/rot projection
ROW_BIAS2 = ROW_BIAS1 + 8          # (1, 2*H)  folded LN beta for gate/up
ROW_COS = ROW_BIAS2 + 8            # (ROWS, D) RoPE cos table (split-half per-head layout)
ROW_SIN = ROW_COS + ROWS           # (ROWS, D) RoPE sin table
CROWS = ROW_SIN + ROWS             # 208 rows total


# ------------------------------------------------------------------ kernel
def kernel(x_ref, c_ref, o_ref):
    x = x_ref[...]                                            # (ROWS, D)

    def norm(v):                                              # LayerNorm without affine
        mu = jnp.mean(v, axis=-1, keepdims=True)              # (affine folded into weights)
        var = jnp.mean((v - mu) ** 2, axis=-1, keepdims=True)
        return (v - mu) * jax.lax.rsqrt(var + EPS)

    # ---- static views into the packed constant slab (zero-cost ref slices) ----
    wproj = c_ref[ROW_WPROJ:ROW_WPROJ + D, :]                 # (D, 5D)
    bias1 = c_ref[ROW_BIAS1:ROW_BIAS1 + 1, :]                 # (1, 5D)
    wo = c_ref[ROW_WO:ROW_WO + D, 0:D]                        # (D, D)
    w13 = c_ref[ROW_W13:ROW_W13 + D, 0:2 * HIDDEN]            # (D, 2H)
    bias2 = c_ref[ROW_BIAS2:ROW_BIAS2 + 1, 0:2 * HIDDEN]      # (1, 2H)
    w2 = c_ref[ROW_W2:ROW_W2 + HIDDEN, 0:D]                   # (H, D)
    cos = c_ref[ROW_COS:ROW_COS + ROWS, 0:D]                  # (ROWS, D)
    sin = c_ref[ROW_SIN:ROW_SIN + ROWS, 0:D]                  # (ROWS, D)

    # ---- attention branch ----
    h1 = norm(x)
    # one fused projection: [q | k | v | rot(q) | rot(k)]  (LN affine already folded in)
    proj = jnp.dot(h1, wproj, preferred_element_type=jnp.float32) + bias1   # (ROWS, 5D)
    q = proj[:, 0:D]
    k = proj[:, D:2 * D]
    v = proj[:, 2 * D:3 * D]
    q_rot = proj[:, 3 * D:4 * D]
    k_rot = proj[:, 4 * D:5 * D]

    qr = q * cos + q_rot * sin                                # RoPE as pure VPU FMAs
    kr = k * cos + k_rot * sin

    def to_heads(t):                                          # (ROWS, D) -> (B*H, S, hd)
        t4 = t.reshape(B, S, N_HEADS, HEAD_DIM)
        return jnp.transpose(t4, (0, 2, 1, 3)).reshape(B * N_HEADS, S, HEAD_DIM)

    qh, kh, vh = to_heads(qr), to_heads(kr), to_heads(v)

    s = jnp.einsum("gqd,gkd->gqk", qh, kh,
                   preferred_element_type=jnp.float32) * SCALE          # (B*H, S, S)
    # causal mask generated in-kernel (saves a DMA'd mask operand)
    ri = jax.lax.broadcasted_iota(jnp.int32, (S, S), 0)
    ci = jax.lax.broadcasted_iota(jnp.int32, (S, S), 1)
    s = jnp.where((ci <= ri)[None, :, :], s, NEG_INF)

    m = jnp.max(s, axis=-1, keepdims=True)
    p = jnp.exp(s - m)
    p = p * pl.reciprocal(jnp.sum(p, axis=-1, keepdims=True), approx=True)
    ctx = jnp.einsum("gqk,gkd->gqd", p, vh,
                     preferred_element_type=jnp.float32)                 # (B*H, S, hd)
    ctx = jnp.transpose(ctx.reshape(B, N_HEADS, S, HEAD_DIM),
                        (0, 2, 1, 3)).reshape(ROWS, D)

    attn = jnp.dot(ctx, wo, preferred_element_type=jnp.float32)
    h = x + attn                                              # attention dropout = identity

    # ---- feed-forward branch (SwiGLU) ----
    h2 = norm(h)
    ag = jnp.dot(h2, w13, preferred_element_type=jnp.float32) + bias2    # (ROWS, 2H)
    a = ag[:, :HIDDEN]
    g = ag[:, HIDDEN:]
    ff = jnp.dot(jax.nn.silu(a) * g, w2, preferred_element_type=jnp.float32)

    o_ref[...] = (h + ff).astype(o_ref.dtype)                 # ffn dropout = identity


# ------------------------------------------------------------------ wrapper
def transformer_block(x, consts):
    """x: (B, S, D). consts: packed (CROWS, CW) slab. Returns (B, S, D)."""
    x2d = x.reshape(ROWS, D)
    out = pl.pallas_call(
        kernel,
        out_shape=jax.ShapeDtypeStruct((ROWS, D), jnp.float32),
        grid=(1,),                                            # single step on all gens
        in_specs=[
            pl.BlockSpec((ROWS, D), lambda i: (0, 0)),        # activations
            pl.BlockSpec((CROWS, CW), lambda i: (0, 0)),      # packed constants
        ],
        out_specs=pl.BlockSpec((ROWS, D), lambda i: (0, 0)),
        compiler_params=pltpu.CompilerParams(
            dimension_semantics=("arbitrary",)),
    )(x2d, consts)
    return out.reshape(B, S, D)


# ------------------------------------------------------------------ host-side packing
def pack_constants(g1, b1, wq, wk, wv, wo, g2, b2, w1, w3, w2, cos, sin):
    """Pure relabelings of the module parameters -> one lane-padded constant slab."""
    # (1) interleaved (even, odd) RoPE pairs -> split halves, per head.
    perm_head = jnp.concatenate([jnp.arange(0, HEAD_DIM, 2), jnp.arange(1, HEAD_DIM, 2)])
    perm = jnp.concatenate([h * HEAD_DIM + perm_head for h in range(N_HEADS)])
    wq_p, wk_p = wq[:, perm], wk[:, perm]

    # (2) bake the RoPE half-swap (rotate-half with sign) into second weights so the
    #     kernel computes qr = q*cos + rot(q)*sin with zero cross-lane ops.
    rot_head = jnp.concatenate([jnp.arange(HD2, HEAD_DIM), jnp.arange(0, HD2)])
    rot_perm = jnp.concatenate([h * HEAD_DIM + rot_head for h in range(N_HEADS)])
    sign = jnp.tile(jnp.concatenate([-jnp.ones(HD2, jnp.float32),
                                     jnp.ones(HD2, jnp.float32)]), N_HEADS)
    wq_rot = wq_p[:, rot_perm] * sign[None, :]
    wk_rot = wk_p[:, rot_perm] * sign[None, :]

    # (3) fuse projections and fold the LayerNorm affine into them:
    #     LN(x)@W = n@(diag(gamma)@W) + beta@W  with n = (x-mu)*rsqrt(var+eps).
    w_full = jnp.concatenate([wq_p, wk_p, wv, wq_rot, wk_rot], axis=1)   # (D, 5D)
    wproj = w_full * g1.reshape(D, 1)
    bias1 = b1 @ w_full                                                  # (1, 5D)

    w13_raw = jnp.concatenate([w1, w3], axis=1)                          # (D, 2H)
    w13f = w13_raw * g2.reshape(D, 1)
    bias2 = b2 @ w13_raw                                                 # (1, 2H)

    # (4) RoPE tables expanded to the flattened (ROWS, D) split-half layout.
    cos_d = jnp.tile(jnp.concatenate([cos, cos], axis=1), (B, N_HEADS))  # (ROWS, D)
    sin_d = jnp.tile(jnp.concatenate([sin, sin], axis=1), (B, N_HEADS))  # (ROWS, D)

    # (5) pack everything into one slab (zero-padded).
    c = jnp.zeros((CROWS, CW), jnp.float32)
    c = c.at[ROW_WPROJ:ROW_WPROJ + D, :].set(wproj)
    c = c.at[ROW_WO:ROW_WO + D, :D].set(wo)
    c = c.at[ROW_W13:ROW_W13 + D, :2 * HIDDEN].set(w13f)
    c = c.at[ROW_W2:ROW_W2 + HIDDEN, :D].set(w2)
    c = c.at[ROW_BIAS1, :].set(bias1[0])
    c = c.at[ROW_BIAS2, :2 * HIDDEN].set(bias2[0])
    c = c.at[ROW_COS:ROW_COS + ROWS, :D].set(cos_d)
    c = c.at[ROW_SIN:ROW_SIN + ROWS, :D].set(sin_d)
    return c


# ------------------------------------------------------------------ pure-JAX reference
def reference_block(x, mask, cos, sin, params):
    """Mimics the PyTorch module exactly (interleaved-pair RoPE, eval-mode dropout)."""
    (g1, b1, wq, wk, wv, wo, g2, b2, w1, w3, w2) = params

    def ln(v, g, b):
        mu = jnp.mean(v, -1, keepdims=True)
        var = jnp.mean((v - mu) ** 2, -1, keepdims=True)
        return (v - mu) / jnp.sqrt(var + EPS) * g + b

    h1 = ln(x, g1[0], b1[0])
    q = (h1 @ wq).reshape(B, S, N_HEADS, HEAD_DIM)
    k = (h1 @ wk).reshape(B, S, N_HEADS, HEAD_DIM)
    v = (h1 @ wv).reshape(B, S, N_HEADS, HEAD_DIM)

    def rope(t):  # interleaved pairs, like torch.view_as_complex on (..., HD2, 2)
        tr = t.reshape(B, S, N_HEADS, HD2, 2)
        e, o = tr[..., 0], tr[..., 1]
        c = cos[None, :, None, :]
        s = sin[None, :, None, :]
        re, ro = e * c - o * s, e * s + o * c
        return jnp.stack([re, ro], axis=-1).reshape(B, S, N_HEADS, HEAD_DIM)

    qr, kr = rope(q), rope(k)
    scores = jnp.einsum("bqhd,bkhd->bhqk", qr, kr) / math.sqrt(HEAD_DIM)
    scores = scores + mask[None, None]
    p = jax.nn.softmax(scores, axis=-1)
    attn = jnp.einsum("bhqk,bkhd->bqhd", p, v).reshape(B, S, D) @ wo
    h = x + attn

    h2 = ln(h, g2[0], b2[0])
    ff = (jax.nn.silu(h2 @ w1) * (h2 @ w3)) @ w2
    return h + ff


# ------------------------------------------------------------------ main
if __name__ == "__main__":
    key = jax.random.PRNGKey(0)
    ks = jax.random.split(key, 12)

    x = jax.random.normal(ks[0], (B, S, D), jnp.float32)

    # rotary tables (freqs_cis split into cos/sin)
    inv_freq = 1.0 / (10000.0 ** (jnp.arange(0, HEAD_DIM, 2, dtype=jnp.float32) / HEAD_DIM))
    ang = jnp.outer(jnp.arange(S, dtype=jnp.float32), inv_freq)          # (S, HD2)
    cos, sin = jnp.cos(ang), jnp.sin(ang)

    # additive causal mask (reference only; the kernel builds it from iota)
    mask = jnp.triu(jnp.full((S, S), NEG_INF, jnp.float32), k=1)

    # deterministic parameters (math layout [in, out])
    def w(kk, shape):
        return 0.02 * jax.random.normal(kk, shape, jnp.float32)

    g1 = 1.0 + 0.1 * jax.random.normal(ks[1], (1, D), jnp.float32)
    b1 = 0.01 * jax.random.normal(ks[2], (1, D), jnp.float32)
    g2 = 1.0 + 0.1 * jax.random.normal(ks[3], (1, D), jnp.float32)
    b2 = 0.01 * jax.random.normal(ks[4], (1, D), jnp.float32)
    wq = w(ks[5], (D, D))
    wk = w(ks[6], (D, D))
    wv = w(ks[7], (D, D))
    wo = w(ks[8], (D, D))
    w1 = w(ks[9], (D, HIDDEN))
    w3 = w(ks[10], (D, HIDDEN))
    w2 = w(ks[11], (HIDDEN, D))

    consts = pack_constants(g1, b1, wq, wk, wv, wo, g2, b2, w1, w3, w2, cos, sin)

    out = transformer_block(x, consts)
    out = jax.block_until_ready(out)

    with jax.default_matmul_precision("float32"):
        ref = reference_block(x, mask, cos, sin,
                              (g1, b1, wq, wk, wv, wo, g2, b2, w1, w3, w2))

    if not jnp.allclose(out, ref, rtol=5e-4, atol=5e-4):
        raise AssertionError("Pallas kernel does not match pure-JAX reference")

    print("KERNEL_OK")
</pallas_src>

<mosaic_0001>
module attributes {stable_mosaic.version = 11 : i64} {
  func.func @kernel(%arg0: i32, %arg1: memref<16x32xf32, #tpu.memory_space<vmem>>, %arg2: memref<208x160xf32, #tpu.memory_space<vmem>>, %arg3: memref<16x32xf32, #tpu.memory_space<vmem>>) attributes {dimension_semantics = [#tpu.dimension_semantics<arbitrary>], iteration_bounds = array<i64: 1>, scalar_prefetch = 0 : i64, scratch_operands = 0 : i64, tpu.core_type = #tpu.core_type<tc>, window_params = [{pipeline_mode = #tpu.pipeline_mode<synchronous>, transform_indices = @transform_0, window_bounds = array<i64: 16, 32>}, {pipeline_mode = #tpu.pipeline_mode<synchronous>, transform_indices = @transform_1, window_bounds = array<i64: 208, 160>}, {pipeline_mode = #tpu.pipeline_mode<synchronous>, transform_indices = @transform_2, window_bounds = array<i64: 16, 32>}]} {
    %c0 = arith.constant 0 : index
    %c0_0 = arith.constant 0 : index
    %0 = vector.load %arg1[%c0, %c0_0] : memref<16x32xf32, #tpu.memory_space<vmem>>, vector<16x32xf32>
    %c0_1 = arith.constant 0 : index
    %c0_2 = arith.constant 0 : index
    %1 = vector.load %arg2[%c0_1, %c0_2] : memref<208x160xf32, #tpu.memory_space<vmem>>, vector<32x160xf32>
    %c160 = arith.constant 160 : index
    %c0_3 = arith.constant 0 : index
    %2 = vector.load %arg2[%c160, %c0_3] : memref<208x160xf32, #tpu.memory_space<vmem>>, vector<1x160xf32>
    %c32 = arith.constant 32 : index
    %c0_4 = arith.constant 0 : index
    %3 = vector.load %arg2[%c32, %c0_4] : memref<208x160xf32, #tpu.memory_space<vmem>>, vector<32x32xf32>
    %c64 = arith.constant 64 : index
    %c0_5 = arith.constant 0 : index
    %4 = vector.load %arg2[%c64, %c0_5] : memref<208x160xf32, #tpu.memory_space<vmem>>, vector<32x128xf32>
    %c168 = arith.constant 168 : index
    %c0_6 = arith.constant 0 : index
    %5 = vector.load %arg2[%c168, %c0_6] : memref<208x160xf32, #tpu.memory_space<vmem>>, vector<1x128xf32>
    %c96 = arith.constant 96 : index
    %c0_7 = arith.constant 0 : index
    %6 = vector.load %arg2[%c96, %c0_7] : memref<208x160xf32, #tpu.memory_space<vmem>>, vector<64x32xf32>
    %c176 = arith.constant 176 : index
    %c0_8 = arith.constant 0 : index
    %7 = vector.load %arg2[%c176, %c0_8] : memref<208x160xf32, #tpu.memory_space<vmem>>, vector<16x32xf32>
    %c192 = arith.constant 192 : index
    %c0_9 = arith.constant 0 : index
    %8 = vector.load %arg2[%c192, %c0_9] : memref<208x160xf32, #tpu.memory_space<vmem>>, vector<16x32xf32>
    %cst = arith.constant dense<0.000000e+00> : vector<16xf32>
    %9 = vector.multi_reduction <add>, %0, %cst [1] : vector<16x32xf32> to vector<16xf32>
    %10 = vector.shape_cast %9 : vector<16xf32> to vector<16x1xf32>
    %cst_10 = arith.constant 3.200000e+01 : f32
    %11 = vector.broadcast %cst_10 : f32 to vector<16x1xf32>
    %12 = arith.divf %10, %11 : vector<16x1xf32>
    %13 = vector.broadcast %12 : vector<16x1xf32> to vector<16x32xf32>
    %14 = arith.subf %0, %13 : vector<16x32xf32>
    %15 = arith.mulf %14, %14 : vector<16x32xf32>
    %cst_11 = arith.constant dense<0.000000e+00> : vector<16xf32>
    %16 = vector.multi_reduction <add>, %15, %cst_11 [1] : vector<16x32xf32> to vector<16xf32>
    %17 = vector.shape_cast %16 : vector<16xf32> to vector<16x1xf32>
    %cst_12 = arith.constant 3.200000e+01 : f32
    %18 = vector.broadcast %cst_12 : f32 to vector<16x1xf32>
    %19 = arith.divf %17, %18 : vector<16x1xf32>
    %20 = vector.broadcast %12 : vector<16x1xf32> to vector<16x32xf32>
    %21 = arith.subf %0, %20 : vector<16x32xf32>
    %cst_13 = arith.constant 9.99999974E-6 : f32
    %22 = vector.broadcast %cst_13 : f32 to vector<16x1xf32>
    %23 = arith.addf %19, %22 : vector<16x1xf32>
    %24 = math.rsqrt %23 : vector<16x1xf32>
    %25 = vector.broadcast %24 : vector<16x1xf32> to vector<16x32xf32>
    %26 = arith.mulf %21, %25 : vector<16x32xf32>
    %cst_14 = arith.constant dense<0.000000e+00> : vector<16x160xf32>
    %27 = tpu.matmul %26, %1, %cst_14 {dimension_numbers = #tpu.dot_dimension_numbers<[1], [0], [0], [1], [0, 0, 1, 1], [], []>} : vector<16x32xf32>, vector<32x160xf32>, vector<16x160xf32> -> vector<16x160xf32>
    %28 = vector.broadcast %2 : vector<1x160xf32> to vector<16x160xf32>
    %29 = arith.addf %27, %28 : vector<16x160xf32>
    %30 = vector.extract_strided_slice %29 {offsets = [0, 0], sizes = [16, 32], strides = [1, 1]} : vector<16x160xf32> to vector<16x32xf32>
    %31 = vector.extract_strided_slice %29 {offsets = [0, 32], sizes = [16, 32], strides = [1, 1]} : vector<16x160xf32> to vector<16x32xf32>
    %32 = vector.extract_strided_slice %29 {offsets = [0, 64], sizes = [16, 32], strides = [1, 1]} : vector<16x160xf32> to vector<16x32xf32>
    %33 = vector.extract_strided_slice %29 {offsets = [0, 96], sizes = [16, 32], strides = [1, 1]} : vector<16x160xf32> to vector<16x32xf32>
    %34 = vector.extract_strided_slice %29 {offsets = [0, 128], sizes = [16, 32], strides = [1, 1]} : vector<16x160xf32> to vector<16x32xf32>
    %35 = arith.mulf %30, %7 : vector<16x32xf32>
    %36 = arith.mulf %33, %8 : vector<16x32xf32>
    %37 = arith.addf %35, %36 : vector<16x32xf32>
    %38 = arith.mulf %31, %7 : vector<16x32xf32>
    %39 = arith.mulf %34, %8 : vector<16x32xf32>
    %40 = arith.addf %38, %39 : vector<16x32xf32>
    %41 = vector.shape_cast %37 : vector<16x32xf32> to vector<2x8x4x8xf32>
    %42 = tpu.transpose %41, [0, 2, 1, 3] : vector<2x8x4x8xf32> -> vector<2x4x8x8xf32>
    %43 = vector.shape_cast %42 : vector<2x4x8x8xf32> to vector<8x8x8xf32>
    %44 = vector.shape_cast %40 : vector<16x32xf32> to vector<2x8x4x8xf32>
    %45 = tpu.transpose %44, [0, 2, 1, 3] : vector<2x8x4x8xf32> -> vector<2x4x8x8xf32>
    %46 = vector.shape_cast %45 : vector<2x4x8x8xf32> to vector<8x8x8xf32>
    %47 = vector.shape_cast %32 : vector<16x32xf32> to vector<2x8x4x8xf32>
    %48 = tpu.transpose %47, [0, 2, 1, 3] : vector<2x8x4x8xf32> -> vector<2x4x8x8xf32>
    %49 = vector.shape_cast %48 : vector<2x4x8x8xf32> to vector<8x8x8xf32>
    "tpu.trace_start"() <{level = 10 : i32, message = "gqd,gkd->gqk"}> : () -> ()
    %cst_15 = arith.constant dense<0.000000e+00> : vector<8x8x8xf32>
    %50 = tpu.matmul %43, %46, %cst_15 {dimension_numbers = #tpu.dot_dimension_numbers<[2], [2], [1], [1], [0, 0, 0, 1, 1, 1], [0], [0]>} : vector<8x8x8xf32>, vector<8x8x8xf32>, vector<8x8x8xf32> -> vector<8x8x8xf32>
    "tpu.trace_stop"() : () -> ()
    %cst_16 = arith.constant 0.353553385 : f32
    %51 = vector.broadcast %cst_16 : f32 to vector<8x8x8xf32>
    %52 = arith.mulf %50, %51 : vector<8x8x8xf32>
    %53 = tpu.iota {dimensions = array<i32: 0>} : vector<8x8xi32>
    %54 = tpu.iota {dimensions = array<i32: 1>} : vector<8x8xi32>
    %55 = arith.cmpi sle, %54, %53 : vector<8x8xi32>
    %56 = vector.shape_cast %55 : vector<8x8xi1> to vector<1x8x8xi1>
    %cst_17 = arith.constant -1.000000e+30 : f32
    %57 = vector.shape_cast %56 : vector<1x8x8xi1> to vector<1x8x8xi1>
    %58 = vector.broadcast %57 : vector<1x8x8xi1> to vector<8x8x8xi1>
    %59 = vector.broadcast %cst_17 : f32 to vector<8x8x8xf32>
    %60 = arith.select %58, %52, %59 : vector<8x8x8xi1>, vector<8x8x8xf32>
    %cst_18 = arith.constant dense<0xFF800000> : vector<8x8xf32>
    %61 = vector.multi_reduction <maximumf>, %60, %cst_18 [2] : vector<8x8x8xf32> to vector<8x8xf32>
    %62 = vector.shape_cast %61 : vector<8x8xf32> to vector<8x8x1xf32>
    %63 = vector.broadcast %62 : vector<8x8x1xf32> to vector<8x8x8xf32>
    %64 = arith.subf %60, %63 : vector<8x8x8xf32>
    %65 = math.exp %64 : vector<8x8x8xf32>
    %cst_19 = arith.constant dense<0.000000e+00> : vector<8x8xf32>
    %66 = vector.multi_reduction <add>, %65, %cst_19 [2] : vector<8x8x8xf32> to vector<8x8xf32>
    %67 = vector.shape_cast %66 : vector<8x8xf32> to vector<8x8x1xf32>
    %68 = tpu.reciprocal %67 {approx = true} : vector<8x8x1xf32> -> vector<8x8x1xf32>
    %69 = vector.broadcast %68 : vector<8x8x1xf32> to vector<8x8x8xf32>
    %70 = arith.mulf %65, %69 : vector<8x8x8xf32>
    "tpu.trace_start"() <{level = 10 : i32, message = "gqk,gkd->gqd"}> : () -> ()
    %cst_20 = arith.constant dense<0.000000e+00> : vector<8x8x8xf32>
    %71 = tpu.matmul %70, %49, %cst_20 {dimension_numbers = #tpu.dot_dimension_numbers<[2], [1], [1], [2], [0, 0, 0, 1, 1, 2], [0], [0]>} : vector<8x8x8xf32>, vector<8x8x8xf32>, vector<8x8x8xf32> -> vector<8x8x8xf32>
    "tpu.trace_stop"() : () -> ()
    %72 = vector.shape_cast %71 : vector<8x8x8xf32> to vector<2x4x8x8xf32>
    %73 = tpu.transpose %72, [0, 2, 1, 3] : vector<2x4x8x8xf32> -> vector<2x8x4x8xf32>
    %74 = vector.shape_cast %73 : vector<2x8x4x8xf32> to vector<16x32xf32>
    %cst_21 = arith.constant dense<0.000000e+00> : vector<16x32xf32>
    %75 = tpu.matmul %74, %3, %cst_21 {dimension_numbers = #tpu.dot_dimension_numbers<[1], [0], [0], [1], [0, 0, 1, 1], [], []>} : vector<16x32xf32>, vector<32x32xf32>, vector<16x32xf32> -> vector<16x32xf32>
    %76 = arith.addf %0, %75 : vector<16x32xf32>
    %cst_22 = arith.constant dense<0.000000e+00> : vector<16xf32>
    %77 = vector.multi_reduction <add>, %76, %cst_22 [1] : vector<16x32xf32> to vector<16xf32>
    %78 = vector.shape_cast %77 : vector<16xf32> to vector<16x1xf32>
    %cst_23 = arith.constant 3.200000e+01 : f32
    %79 = vector.broadcast %cst_23 : f32 to vector<16x1xf32>
    %80 = arith.divf %78, %79 : vector<16x1xf32>
    %81 = vector.broadcast %80 : vector<16x1xf32> to vector<16x32xf32>
    %82 = arith.subf %76, %81 : vector<16x32xf32>
    %83 = arith.mulf %82, %82 : vector<16x32xf32>
    %cst_24 = arith.constant dense<0.000000e+00> : vector<16xf32>
    %84 = vector.multi_reduction <add>, %83, %cst_24 [1] : vector<16x32xf32> to vector<16xf32>
    %85 = vector.shape_cast %84 : vector<16xf32> to vector<16x1xf32>
    %cst_25 = arith.constant 3.200000e+01 : f32
    %86 = vector.broadcast %cst_25 : f32 to vector<16x1xf32>
    %87 = arith.divf %85, %86 : vector<16x1xf32>
    %88 = vector.broadcast %80 : vector<16x1xf32> to vector<16x32xf32>
    %89 = arith.subf %76, %88 : vector<16x32xf32>
    %cst_26 = arith.constant 9.99999974E-6 : f32
    %90 = vector.broadcast %cst_26 : f32 to vector<16x1xf32>
    %91 = arith.addf %87, %90 : vector<16x1xf32>
    %92 = math.rsqrt %91 : vector<16x1xf32>
    %93 = vector.broadcast %92 : vector<16x1xf32> to vector<16x32xf32>
    %94 = arith.mulf %89, %93 : vector<16x32xf32>
    %cst_27 = arith.constant dense<0.000000e+00> : vector<16x128xf32>
    %95 = tpu.matmul %94, %4, %cst_27 {dimension_numbers = #tpu.dot_dimension_numbers<[1], [0], [0], [1], [0, 0, 1, 1], [], []>} : vector<16x32xf32>, vector<32x128xf32>, vector<16x128xf32> -> vector<16x128xf32>
    %96 = vector.broadcast %5 : vector<1x128xf32> to vector<16x128xf32>
    %97 = arith.addf %95, %96 : vector<16x128xf32>
    %98 = vector.extract_strided_slice %97 {offsets = [0, 0], sizes = [16, 64], strides = [1, 1]} : vector<16x128xf32> to vector<16x64xf32>
    %99 = vector.extract_strided_slice %97 {offsets = [0, 64], sizes = [16, 64], strides = [1, 1]} : vector<16x128xf32> to vector<16x64xf32>
    %100 = arith.negf %98 : vector<16x64xf32>
    %101 = math.exp %100 : vector<16x64xf32>
    %cst_28 = arith.constant 1.000000e+00 : f32
    %102 = vector.broadcast %cst_28 : f32 to vector<16x64xf32>
    %103 = arith.addf %102, %101 : vector<16x64xf32>
    %104 = arith.divf %102, %103 : vector<16x64xf32>
    %105 = arith.mulf %98, %104 : vector<16x64xf32>
    %106 = arith.mulf %105, %99 : vector<16x64xf32>
    %cst_29 = arith.constant dense<0.000000e+00> : vector<16x32xf32>
    %107 = tpu.matmul %106, %6, %cst_29 {dimension_numbers = #tpu.dot_dimension_numbers<[1], [0], [0], [1], [0, 0, 1, 1], [], []>} : vector<16x64xf32>, vector<64x32xf32>, vector<16x32xf32> -> vector<16x32xf32>
    %108 = arith.addf %76, %107 : vector<16x32xf32>
    %c0_30 = arith.constant 0 : index
    %c0_31 = arith.constant 0 : index
    %109 = vector.load %arg3[%c0_30, %c0_31] : memref<16x32xf32, #tpu.memory_space<vmem>>, vector<16x32xf32>
    tpu.vector_store %arg3[%c0_30, %c0_31], %108 {strides = array<i32>} : memref<16x32xf32, #tpu.memory_space<vmem>>, vector<16x32xf32>,
    return
  }
  func.func @transform_0(%arg0: i32) -> (i32, i32) {
    %c0_i32 = arith.constant 0 : i32
    %c0_i32_0 = arith.constant 0 : i32
    %c0_i32_1 = arith.constant 0 : i32
    return %c0_i32, %c0_i32_0 : i32, i32
  }
  func.func @transform_1(%arg0: i32) -> (i32, i32) {
    %c0_i32 = arith.constant 0 : i32
    %c0_i32_0 = arith.constant 0 : i32
    %c0_i32_1 = arith.constant 0 : i32
    return %c0_i32, %c0_i32_0 : i32, i32
  }
  func.func @transform_2(%arg0: i32) -> (i32, i32) {
    %c0_i32 = arith.constant 0 : i32
    %c0_i32_0 = arith.constant 0 : i32
    %c0_i32_1 = arith.constant 0 : i32
    return %c0_i32, %c0_i32_0 : i32, i32
  }
}

</mosaic_0001>

<bundles_post_ra>
// kernel: tpu_custom_call.1
= control target key start
LH: loop header
LB: loop body
LE: loop exit
PB: predicated region body
PF: predicated region fallthrough
CT: control target
= control target key end

     0   :  { %vm45_vm0 = vcmask 261120   ;;  %s2816_s0 = inlined_call_operand.vmem [shape: f32[16,32], index: 0, kind: input, shape index: {}]   ;;  %s2817_s1 = inlined_call_operand.vmem [shape: f32[208,160], index: 1, kind: input, shape index: {}]   ;;  %s2818_s2 = inlined_call_operand.hbm [shape: f32[16,32], index: 2, kind: output, shape index: {}]  }
   0x1   :  { %v12_v0 = vld [vmem:[%s2816_s0] sm:$0xff] }
   0x2   :  { %7 = vsyncpa [#allocation3], 0  ;;  %v46_v1 = vsel %vm45_vm0, %v12_v0, 0.0  ;;  %v13_v2 = vld [vmem:[%s2816_s0 + $0x8] sm:$0xff]  ;;  %v2081_v4 = vmov 32.0   ;;  %v20_v21 = vld [vmem:[%s2817_s1 + $0x30] sm:$0xff] }
   0x3   :  { %47 = vadd.xlane.f32.xlu0 %v46_v1  ;;  %v49_v3 = vsel %vm45_vm0, %v13_v2, 0.0  ;;  %2003 = vrcp.f32 %v2081_v4  ;;  %120 = vmatpush.msra.mxu1 %v20_v21  ;;  %v18_v22 = vld [vmem:[%s2817_s1 + $0x20] sm:$0xff]  ;;  %v16_v23 = vld [vmem:[%s2817_s1 + $0x10] sm:$0xff]  ;;  %v21_v25 = vld [vmem:[%s2817_s1 + $0x38] sm:$0xff]  ;;  %s2082_s3 = smov 96   ;;  %s2083_s6 = smov 32  }
   0x4   :  { %v14_v24 = vld [vmem:[%s2817_s1] sm:$0xff]  ;;  %v19_v26 = vld [vmem:[%s2817_s1 + $0x28] sm:$0xff]  ;;  %v17_v29 = vld [vmem:[%s2817_s1 + $0x18] sm:$0xff]  ;;  %s2084_s13 = smov 104   ;;  %s2085_s14 = smov 112   ;;  %vm219_vm8 = vcmask 1047556  }
   0x5   :  { %121 = vmatpush.msra.mxu1 %v18_v22  ;;  %v15_v30 = vld [vmem:[%s2817_s1 + $0x8] sm:$0xff]  ;;  %v43_v31 = vld [vmem:[%s2817_s1 + $0x180] sm:$0xff]  ;;  %v2157_v35 = vld [vmem:[%s2817_s1 + $0x170] sm:$0xff]  ;;  %s2086_s15 = smov 120   ;;  %vm955_vm9 = vcmask 64512   ;;  %s2089_s16 = smov 64  }
   0x6   :  { %v2164_v41 = vld [vmem:[%s2817_s1 + $0x160] sm:$0xff]  ;;  %v44_v61 = vld [vmem:[%s2817_s1 + $0x190] sm:$0xff]  ;;  %s2090_s17 = smov 16   ;;  %s2091_s18 = smov 24   ;;  %vm1705_vm11 = vcmask 130048   ;;  %vm1708_vm12 = vcmask 195584  }
   0x7   :  { %122 = vmatpush.msra.mxu1 %v16_v23  ;;  %178 = vrot.lane.b32.xlu2 %v2164_v41, %s2083_s6  ;;  %v1917_v56 = vld [vmem:[%s2817_s1 + $0x140] ss:$8 sm:$0x3]  ;;  %s2092_s19 = smov 8   ;;  %s2094_s5 = smov 128  }
   0x8   :  { %v99_v57 = vperm.slane %v1917_v56, 1  ;;  %v98_v1 = vperm.slane %v1917_v56, 0 }
   0x9   :  { %v2004_v5 = vpop.eup %2003  ;;  %123 = vmatpush.msra.mxu1 %v14_v24 }
   0xa   :  { %v53_v6 = vmul.f32 32.0, %v2004_v5  ;;  %vm57_vm1 = vweird.f32 %v2004_v5 }
   0xb   :  { %50 = vadd.xlane.f32.xlu0 %v49_v3  ;;  %143 = vmatpush.msrb.mxu1 %v21_v25 }
   0xc   :  { %v54_v7 = vsub.f32 1.0, %v53_v6 }
   0xd   :  { %144 = vmatpush.msrb.mxu1 %v19_v26 }
   0xe   :  { %v55_v8 = vmul.f32 %v2004_v5, %v54_v7 }
   0xf   :  { %145 = vmatpush.msrb.mxu1 %v17_v29 }
  0x10   :  { %v56_v9 = vadd.f32 %v2004_v5, %v55_v8 }
  0x11   :  { %146 = vmatpush.msrb.mxu1 %v15_v30 }
  0x12   :  { %v2118_v10 = vsel %vm57_vm1, %v2004_v5, %v56_v9 }
  0x1f   :  { %158 = vrot.lane.b32.xlu0 %v43_v31, %s2082_s3 }
  0x76   :  { %v48_v11 = vpop.xlane.xlu0 %47 }
  0x77   :  { %v59_v12 = vmul.f32 %v2118_v10, %v48_v11 }
  0x79   :  { %v61_v13 = vsub.f32 %v12_v0, %v59_v12 }
  0x7b   :  { %v63_v14 = vmul.f32 %v61_v13, %v61_v13 }
  0x7d   :  { %v65_v15 = vsel %vm45_vm0, %v63_v14, 0.0 }
  0x7e   :  { %66 = vadd.xlane.f32.xlu1 %v65_v15  ;;  %v51_v16 = vpop.xlane.xlu0 %50 }
  0x7f   :  { %v60_v17 = vmul.f32 %v2118_v10, %v51_v16 }
  0x81   :  { %v62_v18 = vsub.f32 %v13_v2, %v60_v17  ;;  %v179_v2 = vpop.permute.xlu2 %178 }
  0x83   :  { %v64_v19 = vmul.f32 %v62_v18, %v62_v18 }
  0x85   :  { %v68_v20 = vsel %vm45_vm0, %v64_v19, 0.0 }
  0x86   :  { %69 = vadd.xlane.f32.xlu1 %v68_v20 }
  0x91   :  { %v159_v9 = vpop.permute.xlu0 %158 }
  0x9f   :  { %180 = vrot.lane.b32.xlu1 %v2157_v35, %s2083_s6 }
  0xf1   :  { %v67_v27 = vpop.xlane.xlu1 %66 }
  0xf2   :  { %v71_v28 = vmul.f32 %v67_v27, %v2118_v10 }
  0xf4   :  { %v73_v32 = vadd.f32 1e-05, %v71_v28 }
  0xf6   :  { %2005 = vrsqrt.f32 %v73_v32  ;;  %vm81_vm3 = vweird.f32 %v73_v32 }
  0xf9   :  { %v70_v33 = vpop.xlane.xlu1 %69 }
  0xfa   :  { %v72_v34 = vmul.f32 %v70_v33, %v2118_v10 }
  0xfc   :  { %v2006_v36 = vpop.eup %2005  ;;  %v74_v37 = vadd.f32 1e-05, %v72_v34 }
  0xfd   :  { %v76_v38 = vmul.f32 %v2006_v36, %v73_v32  ;;  %vm82_vm2 = vweird.f32 %v2006_v36 }
  0xfe   :  { %2007 = vrsqrt.f32 %v74_v37  ;;  %vm83_vm4 = vmor %vm81_vm3, %vm82_vm2  ;;  %vm91_vm6 = vweird.f32 %v74_v37 }
  0xff   :  { %v77_v39 = vmul.f32 %v2006_v36, %v76_v38 }
 0x101   :  { %v78_v40 = vmul.f32 0.5, %v77_v39 }
 0x103   :  { %v79_v42 = vsub.f32 1.5, %v78_v40 }
 0x104   :  { %v2008_v43 = vpop.eup %2007 }
 0x105   :  { %v86_v44 = vmul.f32 %v2008_v43, %v74_v37  ;;  %v80_v45 = vmul.f32 %v2006_v36, %v79_v42  ;;  %vm92_vm5 = vweird.f32 %v2008_v43 }
 0x106   :  { %vm93_vm7 = vmor %vm91_vm6, %vm92_vm5 }
 0x107   :  { %v87_v46 = vmul.f32 %v2008_v43, %v86_v44  ;;  %v84_v47 = vsel %vm83_vm4, %v2006_v36, %v80_v45 }
 0x108   :  { %v95_v48 = vmul.f32 %v84_v47, %v61_v13 }
 0x109   :  { %v88_v49 = vmul.f32 0.5, %v87_v46  ;;  %v2088_v46 = vmov 1934713408  }
 0x10a   :  { %1918 = vmatmul.msk.f32.vlgmr.msra.gmra.mxu1 %vm45_vm0, %v95_v48  ;;  %v248_v47 = vunpack.c.l.s4 %v2088_v46 }
 0x10b   :  { %v89_v50 = vsub.f32 1.5, %v88_v49 }
 0x10d   :  { %v90_v51 = vmul.f32 %v2008_v43, %v89_v50 }
 0x10f   :  { %v94_v52 = vsel %vm93_vm7, %v2008_v43, %v90_v51 }
 0x110   :  { %v96_v53 = vmul.f32 %v94_v52, %v62_v18 }
 0x111   :  { %v181_v8 = vpop.permute.xlu1 %180 }
 0x112   :  { %1919 = vmatmul.msk.f32.gmra.mxu1 %vm45_vm0, %v96_v53 }
 0x11a   :  { %1920 = vmatmul.msk.f32.vlgmr.msrb.gmra.mxu1 %vm45_vm0, %v95_v48 }
 0x122   :  { %1921 = vmatmul.msk.f32.gmra.mxu1 %vm45_vm0, %v96_v53 }
 0x187   :  { %v125_v54 = vpop.f32.mrf.mxu1 }
 0x188   :  { %v2181_v3 = vadd.f32 %v125_v54, %v98_v1 }
 0x18a   :  { %v184_v4 = vmul.f32 %v179_v2, %v2181_v3  ;;  %v164_v14 = vmul.f32 %v159_v9, %v2181_v3  ;;  %v154_v18 = vmul.f32 %v2181_v3, %v2164_v41 }
 0x18f   :  { %v128_v55 = vpop.f32.mrf.mxu1 }
 0x190   :  { %v2184_v7 = vadd.f32 %v128_v55, %v98_v1 }
 0x192   :  { %v185_v11 = vmul.f32 %v181_v8, %v2184_v7  ;;  %v155_v27 = vmul.f32 %v2184_v7, %v2157_v35  ;;  %v1973_v29 = vpack.i.bf16 %v2184_v7, %v2181_v3  ;;  %v2087_v35 = vmov 1983009808  }
 0x193   :  { %v224_v36 = vunpack.c.l.s4 %v2087_v35 }
 0x195   :  { %v2230_v41 = vunpack.c.0.s8 %v224_v36 }
 0x197   :  { %v148_v58 = vpop.f32.mrf.mxu1 }
 0x198   :  { %v149_v59 = vadd.f32 %v148_v58, %v99_v57 }
 0x19a   :  { %v186_v60 = vmul.f32 %v149_v59, %v43_v31 }
 0x19c   :  { %190 = vrot.lane.b32.xlu2 %v186_v60, %s2083_s6 }
 0x19f   :  { %v151_v62 = vpop.f32.mrf.mxu1 }
 0x1a0   :  { %v152_v63 = vadd.f32 %v151_v62, %v99_v57  ;;  %v2239_v57 = vunpack.c.0.s8 %v248_v47 }
 0x1a2   :  { %v187_v0 = vmul.f32 %v152_v63, %v44_v61 }
 0x1a4   :  { %192 = vrot.lane.b32.xlu2 %v187_v0, %s2083_s6 }
 0x1ac   :  { %160 = vrot.lane.b32.xlu2 %v44_v61, %s2082_s3 }
 0x1f6   :  { %v191_v5 = vpop.permute.xlu2 %190 }
 0x1f7   :  { %v196_v6 = vadd.f32 %v191_v5, %v184_v4 }
 0x1f9   :  { %449 = vrot.lane.b32.xlu1 %v196_v6, %s2084_s13  ;;  %445 = vrot.lane.b32.xlu0 %v196_v6, %s2085_s14 }
 0x1fa   :  { %441 = vrot.lane.b32.xlu2 %v196_v6, %s2086_s15 }
 0x1fe   :  { %v193_v12 = vpop.permute.xlu2 %192 }
 0x1ff   :  { %v197_v13 = vadd.f32 %v193_v12, %v185_v11 }
 0x201   :  { %443 = vrot.lane.b32.xlu0 %v197_v13, %s2086_s15 }
 0x202   :  { %168 = vrot.lane.b32.xlu2 %v164_v14, %s2083_s6 }
 0x206   :  { %v161_v15 = vpop.permute.xlu2 %160 }
 0x207   :  { %v165_v16 = vmul.f32 %v161_v15, %v2184_v7 }
 0x209   :  { %170 = vrot.lane.b32.xlu1 %v165_v16, %s2083_s6  ;;  %451 = vrot.lane.b32.xlu0 %v197_v13, %s2084_s13 }
 0x20a   :  { %447 = vrot.lane.b32.xlu2 %v197_v13, %s2085_s14 }
 0x212   :  { %453 = vrot.lane.b32.xlu2 %v196_v6, %s2082_s3 }
 0x254   :  { %v442_v17 = vpop.permute.xlu2 %441 }
 0x25c   :  { %v169_v19 = vpop.permute.xlu2 %168 }
 0x25d   :  { %v2200_v20 = vadd.f32 %v169_v19, %v154_v18 }
 0x25f   :  { %200 = vrot.lane.b32.xlu1 %v2200_v20, %s2086_s15  ;;  %v221_v19 = vrot.slane %v2200_v20, 4 }
 0x264   :  { %v448_v24 = vpop.permute.xlu2 %447 }
 0x267   :  { %457 = vrot.lane.b32.xlu1 %v442_v17, %s2082_s3 }
 0x26b   :  { %v450_v21 = vpop.permute.xlu1 %449  ;;  %v446_v22 = vpop.permute.xlu0 %445 }
 0x26c   :  { %465 = vrot.lane.b32.xlu2 %v450_v21, %s2082_s3  ;;  %461 = vrot.lane.b32.xlu0 %v446_v22, %s2082_s3  ;;  %v454_v30 = vpop.permute.xlu2 %453 }
 0x26d   :  { %v479_v48 = vrot.slane %v454_v30, 4 }
 0x26f   :  { %455 = vrot.lane.b32.xlu1 %v197_v13, %s2082_s3 }
 0x273   :  { %v444_v23 = vpop.permute.xlu0 %443 }
 0x274   :  { %212 = vrot.lane.b32.xlu2 %v2200_v20, %s2084_s13  ;;  %206 = vrot.lane.b32.xlu0 %v2200_v20, %s2085_s14 }
 0x27b   :  { %v452_v25 = vpop.permute.xlu0 %451  ;;  %v171_v26 = vpop.permute.xlu1 %170 }
 0x27c   :  { %463 = vrot.lane.b32.xlu2 %v448_v24, %s2082_s3  ;;  %459 = vrot.lane.b32.xlu0 %v444_v23, %s2082_s3  ;;  %v2217_v28 = vadd.f32 %v171_v26, %v155_v27 }
 0x27d   :  { %467 = vrot.lane.b32.xlu1 %v452_v25, %s2082_s3  ;;  %s1905_s3 = sshll.u32 %s2818_s2, 4  ;;  %s1906_s3 = int_to_ptr.hbm [resolvable:$true] %s1905_s3 }
 0x27e   :  { %v277_v12 = vrot.slane %v2217_v28, 4 }
 0x284   :  { %208 = vrot.lane.b32.xlu2 %v2217_v28, %s2085_s14  ;;  %202 = vrot.lane.b32.xlu0 %v2217_v28, %s2086_s15 }
 0x285   :  { %214 = vrot.lane.b32.xlu1 %v2217_v28, %s2084_s13 }
 0x28c   :  { %1974 = vrot.lane.b32.xlu2 %v1973_v29, %s2085_s14  ;;  %1969 = vrot.lane.b32.xlu0 %v1973_v29, %s2086_s15 }
 0x28d   :  { %1979 = vrot.lane.b32.xlu1 %v1973_v29, %s2084_s13 }
 0x2c6   :  { %v466_v31 = vpop.permute.xlu2 %465 }
 0x2c7   :  { %v489_v37 = vrot.slane %v466_v31, 4 }
 0x2ce   :  { %v213_v32 = vpop.permute.xlu2 %212 }
 0x2cf   :  { %v231_v40 = vrot.slane %v213_v32, 4 }
 0x2d1   :  { %v201_v33 = vpop.permute.xlu1 %200 }
 0x2d2   :  { %v233_v43 = vrot.slane %v201_v33, 4  ;;  %v232_v51 = vsel %vm219_vm8, %v231_v40, %v201_v33 }
 0x2d3   :  { %v238_v61 = vperm.slane %v232_v51, %v2230_v41 }
 0x2d4   :  { %v234_v53 = vsel %vm219_vm8, %v213_v32, %v233_v43 }
 0x2d5   :  { %v242_v1 = vperm.slane %v234_v53, %v2230_v41  ;;  %v243_v16 = vrot.slane %v238_v61, 4 }
 0x2d6   :  { %v464_v34 = vpop.permute.xlu2 %463 }
 0x2d7   :  { %v533_v62 = vrot.slane %v464_v34, 4  ;;  %v255_v26 = vrot.slane %v242_v1, 4 }
 0x2d9   :  { %v458_v38 = vpop.permute.xlu1 %457 }
 0x2da   :  { %v491_v39 = vrot.slane %v458_v38, 4  ;;  %v490_v42 = vsel %vm219_vm8, %v489_v37, %v458_v38 }
 0x2db   :  { %v496_v49 = vperm.slane %v490_v42, %v2230_v41 }
 0x2dc   :  { %v492_v44 = vsel %vm219_vm8, %v466_v31, %v491_v39 }
 0x2dd   :  { %v500_v45 = vperm.slane %v492_v44, %v2230_v41  ;;  %v501_v63 = vrot.slane %v496_v49, 4 }
 0x2de   :  { %v462_v50 = vpop.permute.xlu0 %461  ;;  %v209_v54 = vpop.permute.xlu2 %208 }
 0x2df   :  { %v477_v52 = vrot.slane %v462_v50, 4  ;;  %v480_v55 = vsel %vm219_vm8, %v462_v50, %v479_v48  ;;  %v513_v56 = vrot.slane %v500_v45, 4  ;;  %v275_v2 = vrot.slane %v209_v54, 4 }
 0x2e0   :  { %v488_v59 = vperm.slane %v480_v55, %v2230_v41  ;;  %v278_v23 = vsel %vm219_vm8, %v209_v54, %v277_v12 }
 0x2e1   :  { %v478_v58 = vsel %vm219_vm8, %v477_v52, %v454_v30  ;;  %v456_v60 = vpop.permute.xlu1 %455  ;;  %v276_v22 = vsel %vm219_vm8, %v275_v2, %v2217_v28  ;;  %v2269_v28 = vperm.slane %v278_v23, %v2230_v41 }
 0x2e2   :  { %v484_v0 = vperm.slane %v478_v58, %v2230_v41  ;;  %v514_v4 = vsel %vm219_vm8, %v513_v56, %v488_v59  ;;  %v515_v5 = vrot.slane %v488_v59, 4  ;;  %v534_v9 = vsel %vm219_vm8, %v533_v62, %v456_v60 }
 0x2e3   :  { %v535_v11 = vrot.slane %v456_v60, 4  ;;  %v520_v15 = vperm.slane %v514_v4, %v2239_v57  ;;  %v2261_v25 = vperm.slane %v534_v9, %v2230_v41  ;;  %v2266_v36 = vperm.slane %v276_v22, %v2230_v41 }
 0x2e4   :  { %v502_v6 = vsel %vm219_vm8, %v501_v63, %v484_v0  ;;  %v503_v8 = vrot.slane %v484_v0, 4  ;;  %v516_v14 = vsel %vm219_vm8, %v500_v45, %v515_v5  ;;  %v313_v22 = vrot.slane %v2269_v28, 4 }
 0x2e5   :  { %v508_v13 = vperm.slane %v502_v6, %v2239_v57  ;;  %v524_v18 = vperm.slane %v516_v14, %v2239_v57  ;;  %v536_v29 = vsel %vm219_vm8, %v464_v34, %v535_v11  ;;  %v529_v33 = vrot.slane %v520_v15, 4 }
 0x2e6   :  { %v504_v17 = vsel %vm219_vm8, %v496_v49, %v503_v8  ;;  %v207_v21 = vpop.permute.xlu0 %206  ;;  %v559_v40 = vrot.slane %v2261_v25, 4  ;;  %v544_v44 = vperm.slane %v536_v29, %v2230_v41 }
 0x2e7   :  { %v512_v24 = vperm.slane %v504_v17, %v2239_v57  ;;  %v531_v27 = vrot.slane %v524_v18, 4  ;;  %v218_v30 = vrot.slane %v207_v21, 4  ;;  %v525_v31 = vrot.slane %v508_v13, 4 }
 0x2e8   :  { %v222_v35 = vsel %vm219_vm8, %v207_v21, %v221_v19  ;;  %v530_v47 = vsel %vm219_vm8, 0.0, %v529_v33  ;;  %v571_v4 = vrot.slane %v544_v44, 4  ;;  %v301_v21 = vrot.slane %v2266_v36, 4 }
 0x2e9   :  { %v527_v32 = vrot.slane %v512_v24, 4  ;;  %v220_v37 = vsel %vm219_vm8, %v218_v30, %v2200_v20  ;;  %v230_v38 = vperm.slane %v222_v35, %v2230_v41  ;;  %v532_v34 = vsel %vm219_vm8, 0.0, %v531_v27 }
 0x2ea   :  { %v226_v42 = vperm.slane %v220_v37, %v2230_v41  ;;  %v526_v49 = vsel %vm219_vm8, 0.0, %v525_v31  ;;  %v605_v50 = vrot.slane %v532_v34, 4  ;;  %v600_v2 = vsel %vm219_vm8, %v531_v27, %v520_v15 }
 0x2eb   :  { %v528_v39 = vsel %vm219_vm8, 0.0, %v527_v32  ;;  %v256_v45 = vsel %vm219_vm8, %v255_v26, %v230_v38  ;;  %v257_v46 = vrot.slane %v230_v38, 4  ;;  %v589_v53 = vsel %vm219_vm8, %v527_v32, %v508_v13 }
 0x2ec   :  { %v594_v43 = vrot.slane %v528_v39, 4  ;;  %v244_v20 = vsel %vm219_vm8, %v243_v16, %v226_v42  ;;  %v245_v48 = vrot.slane %v226_v42, 4  ;;  %v262_v56 = vperm.slane %v256_v45, %v2239_v57 }
 0x2ed   :  { %v258_v51 = vsel %vm219_vm8, %v242_v1, %v257_v46  ;;  %v2290_v62 = vperm.slane %v244_v20, %v2239_v57  ;;  %v606_v6 = vsel %vm219_vm8, %v605_v50, %v530_v47  ;;  %v593_v11 = vperm.slane %v589_v53, %v2230_v41 }
 0x2ee   :  { %v460_v52 = vpop.permute.xlu0 %459  ;;  %v595_v54 = vsel %vm219_vm8, %v594_v43, %v526_v49  ;;  %v246_v55 = vsel %vm219_vm8, %v238_v61, %v245_v48  ;;  %v266_v58 = vperm.slane %v258_v51, %v2239_v57  ;;  %v271_v17 = vrot.slane %v262_v56, 4 }
 0x2ef   :  { %v468_v59 = vpop.permute.xlu1 %467  ;;  %v547_v60 = vrot.slane %v460_v52, 4  ;;  %v254_v63 = vperm.slane %v246_v55, %v2239_v57  ;;  %v2294_v1 = vperm.slane %v595_v54, %v2230_v41  ;;  %v267_v16 = vrot.slane %v2290_v62, 4 }
 0x2f0   :  { %v545_v0 = vrot.slane %v468_v59, 4  ;;  %v273_v5 = vrot.slane %v266_v58, 4  ;;  %v610_v24 = vperm.slane %v606_v6, %v2230_v41  ;;  %v604_v38 = vperm.slane %v600_v2, %v2230_v41 }
 0x2f1   :  { %v548_v61 = vsel %vm219_vm8, %v468_v59, %v547_v60  ;;  %v2302_v12 = vrot.slane %v254_v63, 4  ;;  %v611_v15 = vrot.slane %v2294_v1, 4  ;;  %v268_v39 = vsel %vm219_vm8, 0.0, %v267_v16 }
 0x2f2   :  { %v546_v8 = vsel %vm219_vm8, %v545_v0, %v460_v52  ;;  %v556_v9 = vperm.slane %v548_v61, %v2230_v41  ;;  %v274_v13 = vsel %vm219_vm8, 0.0, %v273_v5  ;;  %v272_v34 = vsel %vm219_vm8, 0.0, %v271_v17 }
 0x2f3   :  { %v552_v14 = vperm.slane %v546_v8, %v2230_v41  ;;  %v347_v26 = vrot.slane %v274_v13, 4  ;;  %v612_v31 = vsel %vm219_vm8, %v611_v15, %v593_v11  ;;  %v270_v32 = vsel %vm219_vm8, 0.0, %v2302_v12 }
 0x2f4   :  { %v569_v18 = vrot.slane %v556_v9, 4  ;;  %v572_v19 = vsel %vm219_vm8, %v556_v9, %v571_v4  ;;  %v2323_v43 = vsel %vm219_vm8, %v273_v5, %v262_v56  ;;  %v618_v46 = vperm.slane %v612_v31, %v2239_v57 }
 0x2f5   :  { %v560_v23 = vsel %vm219_vm8, %v552_v14, %v559_v40  ;;  %v557_v27 = vrot.slane %v552_v14, 4  ;;  %v580_v35 = vperm.slane %v572_v19, %v2239_v57  ;;  %v623_v47 = vrot.slane %v610_v24, 4 }
 0x2f6   :  { %v568_v29 = vperm.slane %v560_v23, %v2239_v57  ;;  %v203_v30 = vpop.permute.xlu0 %202  ;;  %v570_v33 = vsel %vm219_vm8, %v569_v18, %v544_v44  ;;  %v336_v44 = vrot.slane %v270_v32, 4  ;;  %v348_v20 = vsel %vm219_vm8, %v347_v26, %v272_v34 }
 0x2f7   :  { %v215_v37 = vpop.permute.xlu1 %214  ;;  %v289_v42 = vrot.slane %v203_v30, 4  ;;  %v558_v48 = vsel %vm219_vm8, %v557_v27, %v2261_v25  ;;  %v2330_v49 = vperm.slane %v570_v33, %v2239_v57  ;;  %v2332_v50 = vrot.slane %v580_v35, 4 }
 0x2f8   :  { %v287_v40 = vrot.slane %v215_v37, 4  ;;  %v583_v45 = vrot.slane %v568_v29, 4  ;;  %v624_v53 = vsel %vm219_vm8, %v623_v47, %v604_v38  ;;  %v613_v58 = vrot.slane %v593_v11, 4 }
 0x2f9   :  { %v290_v52 = vsel %vm219_vm8, %v215_v37, %v289_v42  ;;  %v630_v56 = vperm.slane %v624_v53, %v2239_v57  ;;  %v564_v25 = vperm.slane %v558_v48, %v2239_v57  ;;  %v625_v60 = vrot.slane %v604_v38, 4 }
 0x2fa   :  { %v288_v51 = vsel %vm219_vm8, %v287_v40, %v203_v30  ;;  %v298_v55 = vperm.slane %v290_v52, %v2230_v41  ;;  %v584_v59 = vsel %vm219_vm8, 0.0, %v583_v45  ;;  %v637_v63 = vrot.slane %v618_v46, 4 }
 0x2fb   :  { %v294_v54 = vperm.slane %v288_v51, %v2230_v41  ;;  %v635_v8 = vrot.slane %v630_v56, 4  ;;  %v614_v9 = vsel %vm219_vm8, %v2294_v1, %v613_v58  ;;  %v626_v15 = vsel %vm219_vm8, %v610_v24, %v625_v60 }
 0x2fc   :  { %v311_v4 = vrot.slane %v298_v55, 4  ;;  %v314_v5 = vsel %vm219_vm8, %v298_v55, %v313_v22  ;;  %v622_v14 = vperm.slane %v614_v9, %v2239_v57  ;;  %v352_v22 = vperm.slane %v348_v20, %v2230_v41 }
 0x2fd   :  { %v299_v0 = vrot.slane %v294_v54, 4  ;;  %v302_v2 = vsel %vm219_vm8, %v294_v54, %v301_v21  ;;  %v322_v6 = vperm.slane %v314_v5, %v2239_v57  ;;  %v636_v1 = vsel %vm219_vm8, %v635_v8, %v618_v46 }
 0x2fe   :  { %v310_v61 = vperm.slane %v302_v2, %v2239_v57  ;;  %v312_v13 = vsel %vm219_vm8, %v311_v4, %v2269_v28  ;;  %v638_v21 = vsel %vm219_vm8, %v630_v56, %v637_v63  ;;  %v641_v28 = vrot.slane %v622_v14, 4  ;;  %1922 = vmatpush.xpose.msk.msra.mxu2 %vm955_vm9, %v636_v1 }
 0x2ff   :  { %v300_v11 = vsel %vm219_vm8, %v299_v0, %v2266_v36  ;;  %v2358_v17 = vperm.slane %v312_v13, %v2239_v57  ;;  %v2360_v19 = vrot.slane %v322_v6, 4  ;;  %v634_v36 = vperm.slane %v626_v15, %v2239_v57  ;;  %1924 = vmatpush.xpose.msk.msra.mxu3 %vm955_vm9, %v638_v21 }
 0x300   :  { %v2355_v16 = vperm.slane %v300_v11, %v2239_v57  ;;  %v325_v18 = vrot.slane %v310_v61, 4  ;;  %v581_v23 = vrot.slane %v564_v25, 4  ;;  %v585_v24 = vrot.slane %v2330_v49, 4 }
 0x301   :  { %v588_v26 = vsel %vm219_vm8, 0.0, %v2332_v50  ;;  %v2376_v29 = vsel %vm219_vm8, 0.0, %v2360_v19  ;;  %v639_v30 = vrot.slane %v634_v36, 4  ;;  %v337_v31 = vsel %vm219_vm8, %v336_v44, %v268_v39 }
 0x302   :  { %v2372_v27 = vsel %vm219_vm8, 0.0, %v325_v18  ;;  %v643_v32 = vsel %vm219_vm8, %v583_v45, %v564_v25  ;;  %v648_v33 = vrot.slane %v584_v59, 4  ;;  %v642_v35 = vsel %vm219_vm8, %v634_v36, %v641_v28 }
 0x303   :  { %v331_v37 = vsel %vm219_vm8, %v2302_v12, %v2290_v62  ;;  %v659_v38 = vrot.slane %v588_v26, 4  ;;  %v323_v34 = vrot.slane %v2355_v16, 4  ;;  %v327_v40 = vrot.slane %v2358_v17, 4  ;;  %1928 = vmatpush.xpose.msk.msrb.mxu3 %vm955_vm9, %v642_v35 }
 0x304   :  { %v640_v42 = vsel %vm219_vm8, %v639_v30, %v622_v14  ;;  %v385_v39 = vsel %vm219_vm8, %v325_v18, %v2355_v16  ;;  %v390_v45 = vrot.slane %v2372_v27, 4  ;;  %v401_v46 = vrot.slane %v2376_v29, 4 }
 0x305   :  { %1926 = vmatpush.xpose.msk.msrb.mxu2 %vm955_vm9, %v640_v42  ;;  %v341_v62 = vperm.slane %v337_v31, %v2230_v41  ;;  %v335_v12 = vperm.slane %v331_v37, %v2230_v41  ;;  %v346_v47 = vperm.slane %v2323_v43, %v2230_v41  ;;  %v365_v44 = vrot.slane %v352_v22, 4 }
 0x306   :  { %v582_v20 = vsel %vm219_vm8, 0.0, %v581_v23  ;;  %v586_v51 = vsel %vm219_vm8, 0.0, %v585_v24  ;;  %v647_v52 = vperm.slane %v643_v32, %v2230_v41  ;;  %v654_v56 = vsel %vm219_vm8, %v2332_v50, %v2330_v49 }
 0x307   :  { %v353_v48 = vrot.slane %v341_v62, 4  ;;  %v649_v53 = vsel %vm219_vm8, %v648_v33, %v582_v20  ;;  %v366_v54 = vsel %vm219_vm8, %v365_v44, %v346_v47  ;;  %v660_v43 = vsel %vm219_vm8, %v659_v38, %v586_v51 }
 0x308   :  { %v653_v55 = vperm.slane %v649_v53, %v2230_v41  ;;  %v372_v25 = vperm.slane %v366_v54, %v2239_v57  ;;  %v658_v59 = vperm.slane %v654_v56, %v2230_v41  ;;  %v664_v60 = vperm.slane %v660_v43, %v2230_v41 }
 0x309   :  { %v354_v58 = vsel %vm219_vm8, %v353_v48, %v335_v12  ;;  %v667_v2 = vrot.slane %v647_v52, 4  ;;  %v355_v4 = vrot.slane %v335_v12, 4  ;;  %v367_v8 = vrot.slane %v346_v47, 4 }
 0x30a   :  { %v360_v63 = vperm.slane %v354_v58, %v2239_v57  ;;  %v665_v0 = vrot.slane %v653_v55, 4  ;;  %v377_v5 = vrot.slane %v372_v25, 4  ;;  %v677_v61 = vrot.slane %v664_v60, 4 }
 0x30b   :  { %v679_v6 = vrot.slane %v658_v59, 4  ;;  %v668_v50 = vsel %vm219_vm8, %v653_v55, %v667_v2  ;;  %v356_v9 = vsel %vm219_vm8, %v341_v62, %v355_v4  ;;  %v368_v36 = vsel %vm219_vm8, %v352_v22, %v367_v8 }
 0x30c   :  { %v379_v49 = vrot.slane %v360_v63, 4  ;;  %v666_v11 = vsel %vm219_vm8, %v665_v0, %v647_v52  ;;  %v378_v13 = vsel %vm219_vm8, %v377_v5, %v360_v63  ;;  %v676_v14 = vperm.slane %v668_v50, %v2239_v57 }
 0x30d   :  { %v680_v15 = vsel %vm219_vm8, %v664_v60, %v679_v6  ;;  %v364_v16 = vperm.slane %v356_v9, %v2239_v57  ;;  %1923 = vmatmul.msk.f32.vlgmr.msra.gmra.mxu2 %vm955_vm9, %v378_v13  ;;  %v672_v21 = vperm.slane %v666_v11, %v2239_v57  ;;  %v324_v28 = vsel %vm219_vm8, 0.0, %v323_v34 }
 0x30e   :  { %v380_v18 = vsel %vm219_vm8, %v372_v25, %v379_v49  ;;  %v688_v1 = vperm.slane %v680_v15, %v2239_v57  ;;  %v695_v23 = vrot.slane %v676_v14, 4  ;;  %v376_v24 = vperm.slane %v368_v36, %v2239_v57 }
 0x30f   :  { %1925 = vmatmul.msk.f32.vlgmr.msra.gmra.mxu3 %vm955_vm9, %v380_v18  ;;  %v678_v26 = vsel %vm219_vm8, %v677_v61, %v658_v59  ;;  %v691_v31 = vrot.slane %v672_v21, 4  ;;  %v383_v32 = vrot.slane %v364_v16, 4  ;;  %v328_v22 = vsel %vm219_vm8, 0.0, %v327_v40 }
 0x310   :  { %v693_v27 = vrot.slane %v688_v1, 4  ;;  %v684_v30 = vperm.slane %v678_v26, %v2239_v57  ;;  %v696_v33 = vsel %vm219_vm8, %v688_v1, %v695_v23  ;;  %v381_v35 = vrot.slane %v376_v24, 4 }
 0x311   :  { %v389_v37 = vperm.slane %v385_v39, %v2230_v41  ;;  %v391_v62 = vsel %vm219_vm8, %v390_v45, %v324_v28  ;;  %v396_v47 = vsel %vm219_vm8, %v2360_v19, %v2358_v17  ;;  %v402_v45 = vsel %vm219_vm8, %v401_v46, %v328_v22 }
 0x312   :  { %v694_v38 = vsel %vm219_vm8, %v693_v27, %v676_v14  ;;  %v689_v34 = vrot.slane %v684_v30, 4  ;;  %v692_v42 = vsel %vm219_vm8, %v684_v30, %v691_v31  ;;  %v395_v12 = vperm.slane %v391_v62, %v2230_v41 }
 0x313   :  { %1934 = vmatpush.xpose.msk.msra.mxu0 %vm955_vm9, %v694_v38  ;;  %1932 = vmatpush.xpose.msk.msra.mxu3 %vm955_vm9, %v692_v42  ;;  %v400_v39 = vperm.slane %v396_v47, %v2230_v41  ;;  %v409_v44 = vrot.slane %v389_v37, 4  ;;  %v382_v20 = vsel %vm219_vm8, %v381_v35, %v364_v16  ;;  %v406_v48 = vperm.slane %v402_v45, %v2230_v41 }
 0x314   :  { %v690_v40 = vsel %vm219_vm8, %v689_v34, %v672_v21  ;;  %v407_v51 = vrot.slane %v395_v12, 4  ;;  %v384_v17 = vsel %vm219_vm8, %v376_v24, %v383_v32  ;;  %v1172_v61 = vlaneseq }
 0x315   :  { %1930 = vmatpush.xpose.msk.msra.mxu2 %vm955_vm9, %v690_v40  ;;  %v421_v19 = vrot.slane %v400_v39, 4  ;;  %v419_v52 = vrot.slane %v406_v48, 4  ;;  %v410_v46 = vsel %vm219_vm8, %v395_v12, %v409_v44  ;;  %v1980_v44 = vpop.permute.xlu1 %1979 }
 0x316   :  { %1927 = vmatmul.msk.f32.vlgmr.msrb.gmra.mxu2 %vm955_vm9, %v382_v20  ;;  %v408_v29 = vsel %vm219_vm8, %v407_v51, %v389_v37  ;;  %v418_v25 = vperm.slane %v410_v46, %v2239_v57  ;;  %v1173_v6 = vshrl.u32 %v1172_v61, 7  ;;  %v1175_v8 = vand.u32 127, %v1172_v61  ;;  %v1975_v20 = vpop.permute.xlu2 %1974  ;;  %v1970_v51 = vpop.permute.xlu0 %1969 }
 0x317   :  { %1936 = vmatpush.xpose.msk.msrb.mxu0 %vm955_vm9, %v696_v33  ;;  %1929 = vmatmul.msk.f32.vlgmr.msrb.gmra.mxu3 %vm955_vm9, %v384_v17  ;;  %v422_v53 = vsel %vm219_vm8, %v406_v48, %v421_v19  ;;  %v414_v54 = vperm.slane %v408_v29, %v2239_v57  ;;  %v420_v56 = vsel %vm219_vm8, %v419_v52, %v400_v39  ;;  %v1981_v48 = vunpack.i.l.bf16 %v1980_v44 }
 0x318   :  { %v430_v55 = vperm.slane %v422_v53, %v2239_v57  ;;  %v426_v43 = vperm.slane %v420_v56, %v2239_v57  ;;  %v437_v4 = vrot.slane %v418_v25, 4  ;;  %vm2469_vm10 = vcmp.le.s32.totalorder %v1175_v8, %v1173_v6 }
 0x319   :  { %v433_v58 = vrot.slane %v414_v54, 4  ;;  %v1976_v17 = vunpack.i.l.bf16 %v1975_v20  ;;  %v1971_v52 = vunpack.i.l.bf16 %v1970_v51  ;;  %v1982_v29 = vunpack.i.h.bf16 %v1980_v44 }
 0x31a   :  { %v435_v59 = vrot.slane %v430_v55, 4  ;;  %v431_v60 = vrot.slane %v426_v43, 4  ;;  %v438_v5 = vsel %vm219_vm8, %v430_v55, %v437_v4  ;;  %v1977_v53 = vunpack.i.h.bf16 %v1975_v20 }
 0x31b   :  { %v434_v2 = vsel %vm219_vm8, %v426_v43, %v433_v58  ;;  %v1988_v19 = vpack.i.bf16 %v1981_v48, %v1976_v17  ;;  %v1983_v46 = vpack.i.bf16 %v1971_v52, %v2181_v3  ;;  %v1972_v55 = vunpack.i.h.bf16 %v1970_v51 }
 0x31c   :  { %v436_v63 = vsel %vm219_vm8, %v435_v59, %v418_v25  ;;  %v432_v0 = vsel %vm219_vm8, %v431_v60, %v414_v54  ;;  %v1998_v54 = vpack.i.bf16 %v1982_v29, %v1977_v53 }
 0x31d   :  { %1935 = vmatmul.msk.f32.vlgmr.msra.gmra.mxu0 %vm955_vm9, %v436_v63  ;;  %v1993_v56 = vpack.i.bf16 %v1972_v55, %v2184_v7 }
 0x31e   :  { %1931 = vmatmul.msk.f32.vlgmr.msra.gmra.mxu2 %vm955_vm9, %v432_v0 }
 0x31f   :  { %1933 = vmatmul.msk.f32.vlgmr.msra.gmra.mxu3 %vm955_vm9, %v434_v2 }
 0x325   :  { %1937 = vmatmul.msk.f32.vlgmr.msrb.gmra.mxu0 %vm955_vm9, %v438_v5 }
 0x390   :  { %v979_v49 = vpop.f32.mrf.mxu2 }
 0x391   :  { %v1164_v9 = vmul.f32 0.35355338, %v979_v49 }
 0x392   :  { %v1005_v11 = vpop.f32.mrf.mxu3 }
 0x393   :  { %v1165_v13 = vmul.f32 0.35355338, %v1005_v11  ;;  %v1179_v14 = vsel %vm2469_vm10, %v1164_v9, -1e+30 }
 0x394   :  { %v1187_v15 = vsel %vm955_vm9, %v1179_v14, -inf }
 0x395   :  { %v1180_v16 = vsel %vm2469_vm10, %v1165_v13, -1e+30  ;;  %1188 = vmax.xlane.f32.xlu0 %v1187_v15 }
 0x396   :  { %v1190_v18 = vsel %vm955_vm9, %v1180_v16, -inf }
 0x397   :  { %1191 = vmax.xlane.f32.xlu2 %v1190_v18 }
 0x399   :  { %v1031_v1 = vpop.f32.mrf.mxu2 }
 0x39a   :  { %v1166_v36 = vmul.f32 0.35355338, %v1031_v1  ;;  %v1057_v21 = vpop.f32.mrf.mxu3  ;;  %v1135_v28 = vpop.f32.mrf.mxu0 }
 0x39b   :  { %v1170_v23 = vmul.f32 0.35355338, %v1135_v28  ;;  %v1167_v31 = vmul.f32 0.35355338, %v1057_v21 }
 0x39c   :  { %v1181_v24 = vsel %vm2469_vm10, %v1166_v36, -1e+30 }
 0x39d   :  { %v1193_v26 = vsel %vm955_vm9, %v1181_v24, -inf  ;;  %v2484_v27 = vsel %vm2469_vm10, %v1170_v23, -1e+30  ;;  %v1182_v37 = vsel %vm2469_vm10, %v1167_v31, -1e+30 }
 0x39e   :  { %1194 = vmax.xlane.f32.xlu1 %v1193_v26  ;;  %v1205_v30 = vsel %vm955_vm9, %v2484_v27, -inf  ;;  %v1196_v12 = vsel %vm955_vm9, %v1182_v37, -inf }
 0x39f   :  { %1206 = vmax.xlane.f32.xlu0 %v1205_v30 }
 0x3a1   :  { %v1083_v38 = vpop.f32.mrf.mxu2 }
 0x3a2   :  { %v1109_v32 = vpop.f32.mrf.mxu3  ;;  %v1161_v33 = vpop.f32.mrf.mxu0  ;;  %v1168_v40 = vmul.f32 0.35355338, %v1083_v38 }
 0x3a3   :  { %v1169_v35 = vmul.f32 0.35355338, %v1109_v32  ;;  %v1171_v22 = vmul.f32 0.35355338, %v1161_v33 }
 0x3a4   :  { %v1183_v39 = vsel %vm2469_vm10, %v1168_v40, -1e+30 }
 0x3a5   :  { %v1184_v34 = vsel %vm2469_vm10, %v1169_v35, -1e+30  ;;  %v2494_v42 = vsel %vm2469_vm10, %v1171_v22, -1e+30  ;;  %v1199_v45 = vsel %vm955_vm9, %v1183_v39, -inf }
 0x3a6   :  { %v1202_v62 = vsel %vm955_vm9, %v1184_v34, -inf  ;;  %v1208_v47 = vsel %vm955_vm9, %v2494_v42, -inf }
 0x3a7   :  { %1203 = vmax.xlane.f32.xlu1 %v1202_v62  ;;  %1197 = vmax.xlane.f32.xlu0 %v1196_v12 }
 0x3a8   :  { %1209 = vmax.xlane.f32.xlu2 %v1208_v47 }
 0x3b0   :  { %1200 = vmax.xlane.f32.xlu2 %v1199_v45 }
 0x3bb   :  { %1989 = vrot.lane.b32.xlu0 %v1988_v19, %s2089_s16 }
 0x3c0   :  { %1984 = vrot.lane.b32.xlu1 %v1983_v46, %s2089_s16 }
 0x3c3   :  { %1999 = vrot.lane.b32.xlu0 %v1998_v54, %s2089_s16 }
 0x3c8   :  { %1994 = vrot.lane.b32.xlu2 %v1993_v56, %s2089_s16 }
 0x408   :  { %v1189_v43 = vpop.xlane.xlu0 %1188 }
 0x409   :  { %v1211_v58 = vsub.f32 %v1179_v14, %v1189_v43 }
 0x40a   :  { %v1192_v25 = vpop.xlane.xlu2 %1191 }
 0x40b   :  { %v1212_v59 = vsub.f32 %v1180_v16, %v1192_v25  ;;  %v1219_v60 = vmul.f32 1.442695, %v1211_v58 }
 0x40d   :  { %v1221_v63 = vmul.f32 1.442695, %v1212_v59  ;;  %2009 = vpow2.f32 %v1219_v60 }
 0x40f   :  { %2011 = vpow2.f32 %v1221_v63 }
 0x411   :  { %v1195_v3 = vpop.xlane.xlu1 %1194 }
 0x412   :  { %v1213_v0 = vsub.f32 %v1181_v24, %v1195_v3  ;;  %v1207_v2 = vpop.xlane.xlu0 %1206 }
 0x413   :  { %v2509_v4 = vpop.eup %2009  ;;  %v1217_v18 = vsub.f32 %v2484_v27, %v1207_v2 }
 0x414   :  { %v1223_v5 = vmul.f32 1.442695, %v1213_v0  ;;  %v1235_v7 = vsel %vm955_vm9, %v2509_v4, 0.0 }
 0x415   :  { %v2511_v61 = vpop.eup %2011  ;;  %1236 = vadd.xlane.f32.xlu1 %v1235_v7  ;;  %v1231_v1 = vmul.f32 1.442695, %v1217_v18 }
 0x416   :  { %2013 = vpow2.f32 %v1223_v5  ;;  %v1238_v6 = vsel %vm955_vm9, %v2511_v61, 0.0 }
 0x417   :  { %1239 = vadd.xlane.f32.xlu2 %v1238_v6 }
 0x41a   :  { %v1204_v8 = vpop.xlane.xlu1 %1203  ;;  %v1198_v50 = vpop.xlane.xlu0 %1197 }
 0x41b   :  { %v1210_v49 = vpop.xlane.xlu2 %1209  ;;  %v1216_v9 = vsub.f32 %v1184_v34, %v1204_v8  ;;  %v1214_v13 = vsub.f32 %v1182_v37, %v1198_v50 }
 0x41c   :  { %v2517_v11 = vpop.eup %2013  ;;  %v1218_v36 = vsub.f32 %v2494_v42, %v1210_v49 }
 0x41d   :  { %v1229_v14 = vmul.f32 1.442695, %v1216_v9  ;;  %v1241_v15 = vsel %vm955_vm9, %v2517_v11, 0.0  ;;  %v1225_v16 = vmul.f32 1.442695, %v1214_v13 }
 0x41e   :  { %1242 = vadd.xlane.f32.xlu0 %v1241_v15  ;;  %v1233_v31 = vmul.f32 1.442695, %v1218_v36 }
 0x41f   :  { %2015 = vpow2.f32 %v1229_v14 }
 0x420   :  { %2017 = vpow2.f32 %v1225_v16 }
 0x421   :  { %2019 = vpow2.f32 %v1231_v1 }
 0x423   :  { %v1201_v21 = vpop.xlane.xlu2 %1200 }
 0x424   :  { %v1215_v28 = vsub.f32 %v1183_v39, %v1201_v21 }
 0x425   :  { %v2523_v23 = vpop.eup %2015 }
 0x426   :  { %v1227_v24 = vmul.f32 1.442695, %v1215_v28  ;;  %v1250_v26 = vsel %vm955_vm9, %v2523_v23, 0.0  ;;  %v2527_v30 = vpop.eup %2017 }
 0x427   :  { %1251 = vadd.xlane.f32.xlu0 %v1250_v26  ;;  %v1244_v27 = vsel %vm955_vm9, %v2527_v30, 0.0  ;;  %v2531_v32 = vpop.eup %2019 }
 0x428   :  { %2021 = vpow2.f32 %v1227_v24  ;;  %1245 = vadd.xlane.f32.xlu1 %v1244_v27  ;;  %v1253_v42 = vsel %vm955_vm9, %v2531_v32, 0.0 }
 0x429   :  { %2023 = vpow2.f32 %v1233_v31 }
 0x42b   :  { %v1995_v22 = vpop.permute.xlu2 %1994 }
 0x42c   :  { %v1997_v12 = vunpack.i.h.bf16 %v1995_v22  ;;  %v1996_v47 = vunpack.i.l.bf16 %v1995_v22 }
 0x42d   :  { %v1990_v35 = vpop.permute.xlu0 %1989 }
 0x42e   :  { %v2533_v33 = vpop.eup %2021  ;;  %v1992_v37 = vunpack.i.h.bf16 %v1990_v35  ;;  %v1991_v38 = vunpack.i.l.bf16 %v1990_v35  ;;  %v805_v29 = vrot.slane %v1997_v12, 4  ;;  %v793_v46 = vrot.slane %v1996_v47, 4 }
 0x42f   :  { %v1247_v34 = vsel %vm955_vm9, %v2533_v33, 0.0  ;;  %v2539_v62 = vpop.eup %2023 }
 0x430   :  { %1248 = vadd.xlane.f32.xlu2 %v1247_v34  ;;  %1254 = vadd.xlane.f32.xlu1 %v1253_v42  ;;  %v747_v39 = vrot.slane %v1992_v37, 4  ;;  %v735_v45 = vrot.slane %v1991_v38, 4  ;;  %v1256_v48 = vsel %vm955_vm9, %v2539_v62, 0.0 }
 0x432   :  { %v1985_v40 = vpop.permute.xlu1 %1984 }
 0x433   :  { %v1987_v44 = vunpack.i.h.bf16 %v1985_v40  ;;  %v1986_v20 = vunpack.i.l.bf16 %v1985_v40 }
 0x435   :  { %v748_v51 = vsel %vm219_vm8, %v747_v39, %v1987_v44  ;;  %v749_v17 = vrot.slane %v1987_v44, 4  ;;  %v736_v19 = vsel %vm219_vm8, %v735_v45, %v1986_v20  ;;  %v737_v52 = vrot.slane %v1986_v20, 4  ;;  %v2000_v55 = vpop.permute.xlu0 %1999 }
 0x436   :  { %v754_v53 = vperm.slane %v748_v51, %v2230_v41  ;;  %v742_v54 = vperm.slane %v736_v19, %v2230_v41  ;;  %v2002_v58 = vunpack.i.h.bf16 %v2000_v55  ;;  %v2001_v25 = vunpack.i.l.bf16 %v2000_v55 }
 0x437   :  { %v750_v56 = vsel %vm219_vm8, %v1992_v37, %v749_v17  ;;  %v738_v43 = vsel %vm219_vm8, %v1991_v38, %v737_v52 }
 0x438   :  { %v758_v59 = vperm.slane %v750_v56, %v2230_v41  ;;  %v759_v60 = vrot.slane %v754_v53, 4  ;;  %v746_v63 = vperm.slane %v738_v43, %v2230_v41  ;;  %v761_v3 = vrot.slane %v742_v54, 4  ;;  %1257 = vadd.xlane.f32.xlu2 %v1256_v48 }
 0x439   :  { %v803_v0 = vrot.slane %v2002_v58, 4  ;;  %v791_v2 = vrot.slane %v2001_v25, 4  ;;  %v794_v5 = vsel %vm219_vm8, %v2001_v25, %v793_v46  ;;  %v806_v7 = vsel %vm219_vm8, %v2002_v58, %v805_v29 }
 0x43a   :  { %v771_v6 = vrot.slane %v758_v59, 4  ;;  %v760_v8 = vsel %vm219_vm8, %v759_v60, %v742_v54  ;;  %v762_v49 = vsel %vm219_vm8, %v754_v53, %v761_v3  ;;  %v773_v50 = vrot.slane %v746_v63, 4 }
 0x43b   :  { %v766_v9 = vperm.slane %v760_v8, %v2239_v57  ;;  %v770_v13 = vperm.slane %v762_v49, %v2239_v57  ;;  %v792_v14 = vsel %vm219_vm8, %v791_v2, %v1996_v47  ;;  %v802_v15 = vperm.slane %v794_v5, %v2230_v41 }
 0x43c   :  { %v772_v16 = vsel %vm219_vm8, %v771_v6, %v746_v63  ;;  %v774_v18 = vsel %vm219_vm8, %v758_v59, %v773_v50  ;;  %v798_v1 = vperm.slane %v792_v14, %v2230_v41  ;;  %v804_v36 = vsel %vm219_vm8, %v803_v0, %v1997_v12 }
 0x43d   :  { %v778_v21 = vperm.slane %v772_v16, %v2239_v57  ;;  %v782_v28 = vperm.slane %v774_v18, %v2239_v57  ;;  %v783_v24 = vrot.slane %v766_v9, 4  ;;  %v785_v26 = vrot.slane %v770_v13, 4 }
 0x43e   :  { %v810_v31 = vperm.slane %v804_v36, %v2230_v41  ;;  %v814_v27 = vperm.slane %v806_v7, %v2230_v41  ;;  %v817_v35 = vrot.slane %v798_v1, 4  ;;  %v829_v22 = vrot.slane %v802_v15, 4 }
 0x43f   :  { %v784_v37 = vsel %vm219_vm8, 0.0, %v783_v24  ;;  %v786_v38 = vsel %vm219_vm8, 0.0, %v785_v26  ;;  %v787_v34 = vrot.slane %v778_v21, 4  ;;  %v789_v42 = vrot.slane %v782_v28, 4 }
 0x440   :  { %v847_v12 = vsel %vm219_vm8, %v785_v26, %v766_v9  ;;  %v852_v47 = vrot.slane %v786_v38, 4  ;;  %v815_v40 = vrot.slane %v810_v31, 4  ;;  %v818_v39 = vsel %vm219_vm8, %v810_v31, %v817_v35 }
 0x441   :  { %v790_v45 = vsel %vm219_vm8, 0.0, %v789_v42  ;;  %v826_v44 = vperm.slane %v818_v39, %v2239_v57  ;;  %v827_v20 = vrot.slane %v814_v27, 4  ;;  %v830_v48 = vsel %vm219_vm8, %v814_v27, %v829_v22 }
 0x442   :  { %v863_v51 = vrot.slane %v790_v45, 4  ;;  %v816_v17 = vsel %vm219_vm8, %v815_v40, %v798_v1  ;;  %v838_v19 = vperm.slane %v830_v48, %v2239_v57  ;;  %v788_v52 = vsel %vm219_vm8, 0.0, %v787_v34 }
 0x443   :  { %v822_v29 = vperm.slane %v816_v17, %v2239_v57  ;;  %v828_v46 = vsel %vm219_vm8, %v827_v20, %v802_v15  ;;  %v841_v53 = vrot.slane %v826_v44, 4  ;;  %v851_v54 = vperm.slane %v847_v12, %v2230_v41 }
 0x444   :  { %v834_v55 = vperm.slane %v828_v46, %v2239_v57  ;;  %v845_v56 = vrot.slane %v838_v19, 4  ;;  %v853_v43 = vsel %vm219_vm8, %v852_v47, %v784_v37  ;;  %v858_v58 = vsel %vm219_vm8, %v789_v42, %v778_v21 }
 0x445   :  { %v839_v25 = vrot.slane %v822_v29, 4  ;;  %v842_v59 = vsel %vm219_vm8, 0.0, %v841_v53  ;;  %v857_v60 = vperm.slane %v853_v43, %v2230_v41  ;;  %v862_v63 = vperm.slane %v858_v58, %v2230_v41 }
 0x446   :  { %v843_v3 = vrot.slane %v834_v55, 4  ;;  %v846_v0 = vsel %vm219_vm8, 0.0, %v845_v56  ;;  %v906_v2 = vrot.slane %v842_v59, 4  ;;  %v912_v5 = vsel %vm219_vm8, %v845_v56, %v834_v55 }
 0x447   :  { %v917_v7 = vrot.slane %v846_v0, 4  ;;  %v864_v6 = vsel %vm219_vm8, %v863_v51, %v788_v52  ;;  %v871_v8 = vrot.slane %v851_v54, 4  ;;  %v883_v49 = vrot.slane %v862_v63, 4 }
 0x448   :  { %v844_v50 = vsel %vm219_vm8, 0.0, %v843_v3  ;;  %v868_v9 = vperm.slane %v864_v6, %v2230_v41  ;;  %v869_v13 = vrot.slane %v857_v60, 4  ;;  %v840_v14 = vsel %vm219_vm8, 0.0, %v839_v25 }
 0x449   :  { %v872_v15 = vsel %vm219_vm8, %v857_v60, %v871_v8  ;;  %v901_v16 = vsel %vm219_vm8, %v841_v53, %v822_v29  ;;  %v907_v18 = vsel %vm219_vm8, %v906_v2, %v840_v14  ;;  %v916_v1 = vperm.slane %v912_v5, %v2230_v41 }
 0x44a   :  { %v880_v36 = vperm.slane %v872_v15, %v2239_v57  ;;  %v884_v21 = vsel %vm219_vm8, %v868_v9, %v883_v49  ;;  %v870_v28 = vsel %vm219_vm8, %v869_v13, %v851_v54  ;;  %v881_v24 = vrot.slane %v868_v9, 4 }
 0x44b   :  { %v892_v26 = vperm.slane %v884_v21, %v2239_v57  ;;  %v876_v31 = vperm.slane %v870_v28, %v2239_v57  ;;  %v905_v27 = vperm.slane %v901_v16, %v2230_v41  ;;  %v911_v35 = vperm.slane %v907_v18, %v2230_v41 }
 0x44c   :  { %v899_v22 = vrot.slane %v880_v36, 4  ;;  %v882_v37 = vsel %vm219_vm8, %v881_v24, %v862_v63  ;;  %v918_v38 = vsel %vm219_vm8, %v917_v7, %v844_v50  ;;  %v937_v34 = vrot.slane %v916_v1, 4 }
 0x44d   :  { %v888_v42 = vperm.slane %v882_v37, %v2239_v57  ;;  %v895_v12 = vrot.slane %v876_v31, 4  ;;  %v897_v47 = vrot.slane %v892_v26, 4  ;;  %v922_v40 = vperm.slane %v918_v38, %v2230_v41 }
 0x44e   :  { %v900_v39 = vsel %vm219_vm8, %v892_v26, %v899_v22  ;;  %v925_v45 = vrot.slane %v905_v27, 4  ;;  %v923_v44 = vrot.slane %v911_v35, 4 }
 0x44f   :  { %1362 = vmatpush.msra.mxu1 %v900_v39  ;;  %v896_v20 = vsel %vm219_vm8, %v888_v42, %v895_v12  ;;  %v898_v48 = vsel %vm219_vm8, %v897_v47, %v880_v36  ;;  %v938_v51 = vsel %vm219_vm8, %v922_v40, %v937_v34  ;;  %v893_v17 = vrot.slane %v888_v42, 4 }
 0x450   :  { %1316 = vmatpush.msrb.mxu3 %v896_v20  ;;  %1339 = vmatpush.msra.mxu0 %v898_v48  ;;  %v926_v19 = vsel %vm219_vm8, %v911_v35, %v925_v45  ;;  %v946_v52 = vperm.slane %v938_v51, %v2239_v57  ;;  %v924_v29 = vsel %vm219_vm8, %v923_v44, %v905_v27  ;;  %v935_v46 = vrot.slane %v922_v40, 4 }
 0x451   :  { %v934_v53 = vperm.slane %v926_v19, %v2239_v57  ;;  %v894_v54 = vsel %vm219_vm8, %v893_v17, %v876_v31  ;;  %v930_v55 = vperm.slane %v924_v29, %v2239_v57 }
 0x452   :  { %v951_v56 = vrot.slane %v946_v52, 4  ;;  %1293 = vmatpush.msrb.mxu2 %v894_v54  ;;  %v936_v43 = vsel %vm219_vm8, %v935_v46, %v916_v1 }
 0x453   :  { %v953_v58 = vrot.slane %v934_v53, 4  ;;  %v942_v25 = vperm.slane %v936_v43, %v2239_v57  ;;  %v949_v59 = vrot.slane %v930_v55, 4 }
 0x454   :  { %v952_v60 = vsel %vm219_vm8, %v951_v56, %v934_v53 }
 0x455   :  { %1431 = vmatpush.msrb.mxu0 %v952_v60  ;;  %v954_v63 = vsel %vm219_vm8, %v946_v52, %v953_v58  ;;  %v947_v3 = vrot.slane %v942_v25, 4  ;;  %v950_v0 = vsel %vm219_vm8, %v942_v25, %v949_v59 }
 0x456   :  { %1454 = vmatpush.msrb.mxu1 %v954_v63  ;;  %1408 = vmatpush.msra.mxu3 %v950_v0 }
 0x457   :  { %v948_v2 = vsel %vm219_vm8, %v947_v3, %v930_v55 }
 0x458   :  { %1385 = vmatpush.msra.mxu2 %v948_v2 }
 0x488   :  { %v1237_v5 = vpop.xlane.xlu1 %1236 }
 0x489   :  { %2025 = vrcp.f32 %v1237_v5 }
 0x48a   :  { %v1240_v7 = vpop.xlane.xlu2 %1239 }
 0x48b   :  { %2027 = vrcp.f32 %v1240_v7 }
 0x48f   :  { %v2026_v6 = vpop.eup %2025 }
 0x490   :  { %v1267_v49 = vmul.f32 %v2026_v6, %v2509_v4 }
 0x491   :  { %v2028_v8 = vpop.eup %2027  ;;  %v1243_v50 = vpop.xlane.xlu0 %1242 }
 0x492   :  { %v1268_v9 = vmul.f32 %v2028_v8, %v2511_v61  ;;  %2029 = vrcp.f32 %v1243_v50  ;;  %1938 = vmatmul.msk.f32.vlgmr.msrb.gmra.mxu2 %vm955_vm9, %v1267_v49 }
 0x494   :  { %1939 = vmatmul.msk.f32.vlgmr.msrb.gmra.mxu3 %vm955_vm9, %v1268_v9 }
 0x498   :  { %v2030_v13 = vpop.eup %2029 }
 0x499   :  { %v1269_v14 = vmul.f32 %v2030_v13, %v2517_v11 }
 0x49a   :  { %v1252_v15 = vpop.xlane.xlu0 %1251 }
 0x49b   :  { %2031 = vrcp.f32 %v1252_v15  ;;  %1940 = vmatmul.msk.f32.vlgmr.msra.gmra.mxu0 %vm955_vm9, %v1269_v14  ;;  %v1246_v16 = vpop.xlane.xlu1 %1245 }
 0x49c   :  { %2033 = vrcp.f32 %v1246_v16 }
 0x4a1   :  { %v2032_v18 = vpop.eup %2031 }
 0x4a2   :  { %v1272_v4 = vmul.f32 %v2032_v18, %v2523_v23  ;;  %v2034_v1 = vpop.eup %2033 }
 0x4a3   :  { %v1249_v36 = vpop.xlane.xlu2 %1248  ;;  %v1270_v61 = vmul.f32 %v2034_v1, %v2527_v30  ;;  %v1255_v21 = vpop.xlane.xlu1 %1254 }
 0x4a4   :  { %2035 = vrcp.f32 %v1249_v36  ;;  %1943 = vmatmul.msk.f32.vlgmr.msra.gmra.mxu3 %vm955_vm9, %v1272_v4 }
 0x4a5   :  { %2037 = vrcp.f32 %v1255_v21  ;;  %1941 = vmatmul.msk.f32.vlgmr.msra.gmra.mxu1 %vm955_vm9, %v1270_v61 }
 0x4aa   :  { %v2036_v11 = vpop.eup %2035 }
 0x4ab   :  { %v2038_v28 = vpop.eup %2037  ;;  %v1271_v24 = vmul.f32 %v2036_v11, %v2533_v33  ;;  %v1258_v26 = vpop.xlane.xlu2 %1257 }
 0x4ac   :  { %v1273_v31 = vmul.f32 %v2038_v28, %v2531_v32  ;;  %2039 = vrcp.f32 %v1258_v26 }
 0x4ad   :  { %1942 = vmatmul.msk.f32.vlgmr.msra.gmra.mxu2 %vm955_vm9, %v1271_v24 }
 0x4ae   :  { %1944 = vmatmul.msk.f32.vlgmr.msrb.gmra.mxu0 %vm955_vm9, %v1273_v31 }
 0x4b2   :  { %v2040_v23 = vpop.eup %2039 }
 0x4b3   :  { %v1274_v30 = vmul.f32 %v2040_v23, %v2539_v62 }
 0x4b5   :  { %1945 = vmatmul.msk.f32.vlgmr.msrb.gmra.mxu1 %vm955_vm9, %v1274_v30 }
 0x515   :  { %v1295_v27 = vpop.f32.mrf.mxu2 }
 0x516   :  { %v1461_v22 = vrot.slane %v1295_v27, 4 }
 0x517   :  { %v1318_v33 = vpop.f32.mrf.mxu3 }
 0x518   :  { %v1341_v35 = vpop.f32.mrf.mxu0  ;;  %v1473_v42 = vrot.slane %v1318_v33, 4 }
 0x519   :  { %v1459_v37 = vrot.slane %v1341_v35, 4  ;;  %v1462_v38 = vsel %vm219_vm8, %v1341_v35, %v1461_v22 }
 0x51a   :  { %v1470_v32 = vperm.slane %v1462_v38, %v2230_v41 }
 0x51b   :  { %v1460_v34 = vsel %vm219_vm8, %v1459_v37, %v1295_v27 }
 0x51c   :  { %v1466_v12 = vperm.slane %v1460_v34, %v2230_v41  ;;  %v1497_v39 = vrot.slane %v1470_v32, 4 }
 0x51e   :  { %v1485_v20 = vrot.slane %v1466_v12, 4 }
 0x522   :  { %v1364_v47 = vpop.f32.mrf.mxu1 }
 0x523   :  { %v1471_v40 = vrot.slane %v1364_v47, 4  ;;  %v1474_v62 = vsel %vm219_vm8, %v1364_v47, %v1473_v42 }
 0x524   :  { %v1482_v45 = vperm.slane %v1474_v62, %v2230_v41 }
 0x525   :  { %v1472_v44 = vsel %vm219_vm8, %v1471_v40, %v1318_v33 }
 0x526   :  { %v1478_v48 = vperm.slane %v1472_v44, %v2230_v41  ;;  %v1495_v51 = vrot.slane %v1482_v45, 4  ;;  %v1498_v17 = vsel %vm219_vm8, %v1482_v45, %v1497_v39 }
 0x527   :  { %v1506_v19 = vperm.slane %v1498_v17, %v2239_v57  ;;  %v1410_v6 = vpop.f32.mrf.mxu3 }
 0x528   :  { %v1483_v52 = vrot.slane %v1478_v48, 4  ;;  %v1486_v29 = vsel %vm219_vm8, %v1478_v48, %v1485_v20  ;;  %v1496_v46 = vsel %vm219_vm8, %v1495_v51, %v1470_v32  ;;  %v1529_v4 = vrot.slane %v1410_v6, 4 }
 0x529   :  { %v1494_v53 = vperm.slane %v1486_v29, %v2239_v57  ;;  %v1502_v54 = vperm.slane %v1496_v46, %v2239_v57  ;;  %v1513_v55 = vrot.slane %v1506_v19, 4 }
 0x52a   :  { %v1484_v56 = vsel %vm219_vm8, %v1483_v52, %v1466_v12 }
 0x52b   :  { %v1490_v43 = vperm.slane %v1484_v56, %v2239_v57  ;;  %v1509_v58 = vrot.slane %v1494_v53, 4  ;;  %v1511_v25 = vrot.slane %v1502_v54, 4  ;;  %v1514_v59 = vsel %vm219_vm8, 0.0, %v1513_v55  ;;  %v1433_v60 = vpop.f32.mrf.mxu0 }
 0x52c   :  { %v1582_v63 = vsel %vm219_vm8, %v1513_v55, %v1502_v54  ;;  %v1587_v3 = vrot.slane %v1514_v59, 4  ;;  %v1515_v49 = vrot.slane %v1433_v60, 4 }
 0x52d   :  { %v1507_v0 = vrot.slane %v1490_v43, 4  ;;  %v1510_v2 = vsel %vm219_vm8, 0.0, %v1509_v58  ;;  %v1512_v5 = vsel %vm219_vm8, 0.0, %v1511_v25  ;;  %v1586_v7 = vperm.slane %v1582_v63, %v2230_v41 }
 0x52e   :  { %v1576_v8 = vrot.slane %v1510_v2, 4  ;;  %v1571_v50 = vsel %vm219_vm8, %v1509_v58, %v1490_v43  ;;  %v1588_v9 = vsel %vm219_vm8, %v1587_v3, %v1512_v5 }
 0x52f   :  { %v1508_v14 = vsel %vm219_vm8, 0.0, %v1507_v0  ;;  %v1575_v15 = vperm.slane %v1571_v50, %v2230_v41  ;;  %v1592_v16 = vperm.slane %v1588_v9, %v2230_v41  ;;  %v1607_v18 = vrot.slane %v1586_v7, 4 }
 0x530   :  { %v1387_v13 = vpop.f32.mrf.mxu2  ;;  %v1577_v61 = vsel %vm219_vm8, %v1576_v8, %v1508_v14 }
 0x531   :  { %v1516_v1 = vsel %vm219_vm8, %v1515_v49, %v1387_v13  ;;  %v1517_v36 = vrot.slane %v1387_v13, 4  ;;  %v1581_v28 = vperm.slane %v1577_v61, %v2230_v41  ;;  %v1595_v24 = vrot.slane %v1575_v15, 4 }
 0x532   :  { %v1522_v21 = vperm.slane %v1516_v1, %v2230_v41  ;;  %v1456_v11 = vpop.f32.mrf.mxu1  ;;  %v1608_v26 = vsel %vm219_vm8, %v1592_v16, %v1607_v18  ;;  %v1605_v62 = vrot.slane %v1592_v16, 4 }
 0x533   :  { %v1518_v31 = vsel %vm219_vm8, %v1433_v60, %v1517_v36  ;;  %v1527_v23 = vrot.slane %v1456_v11, 4  ;;  %v1530_v30 = vsel %vm219_vm8, %v1456_v11, %v1529_v4  ;;  %v1616_v27 = vperm.slane %v1608_v26, %v2239_v57 }
 0x534   :  { %v1526_v35 = vperm.slane %v1518_v31, %v2230_v41  ;;  %v1541_v22 = vrot.slane %v1522_v21, 4  ;;  %v1538_v37 = vperm.slane %v1530_v30, %v2230_v41  ;;  %v1596_v38 = vsel %vm219_vm8, %v1581_v28, %v1595_v24 }
 0x535   :  { %v1528_v33 = vsel %vm219_vm8, %v1527_v23, %v1410_v6  ;;  %v1604_v34 = vperm.slane %v1596_v38, %v2239_v57  ;;  %v1621_v32 = vrot.slane %v1616_v27, 4  ;;  %v1593_v42 = vrot.slane %v1581_v28, 4 }
 0x536   :  { %v1553_v12 = vrot.slane %v1526_v35, 4  ;;  %v1534_v47 = vperm.slane %v1528_v33, %v2230_v41  ;;  %v1551_v40 = vrot.slane %v1538_v37, 4  ;;  %v1606_v55 = vsel %vm219_vm8, %v1605_v62, %v1586_v7 }
 0x537   :  { %v1622_v39 = vsel %vm219_vm8, %v1621_v32, %v1604_v34  ;;  %v1623_v45 = vrot.slane %v1604_v34, 4  ;;  %v1594_v44 = vsel %vm219_vm8, %v1593_v42, %v1575_v15  ;;  %v1612_v59 = vperm.slane %v1606_v55, %v2239_v57 }
 0x538   :  { %v1539_v20 = vrot.slane %v1534_v47, 4  ;;  %v1542_v48 = vsel %vm219_vm8, %v1534_v47, %v1541_v22  ;;  %v1552_v51 = vsel %vm219_vm8, %v1551_v40, %v1526_v35  ;;  %v1554_v17 = vsel %vm219_vm8, %v1538_v37, %v1553_v12  ;;  %1689 = vrot.lane.b32.xlu1 %v1622_v39, %s2090_s17  ;;  %v26_v12 = vld [vmem:[%s2817_s1 + $0x60] sm:$0xff]  ;;  %v25_v47 = vld [vmem:[%s2817_s1 + $0x50] sm:$0xff] }
 0x539   :  { %v1550_v19 = vperm.slane %v1542_v48, %v2239_v57  ;;  %v1558_v52 = vperm.slane %v1552_v51, %v2239_v57  ;;  %v1562_v29 = vperm.slane %v1554_v17, %v2239_v57  ;;  %v1624_v46 = vsel %vm219_vm8, %v1616_v27, %v1623_v45  ;;  %v24_v40 = vld [vmem:[%s2817_s1 + $0x40] sm:$0xff] }
 0x53a   :  { %v1540_v53 = vsel %vm219_vm8, %v1539_v20, %v1522_v21  ;;  %1697 = vrot.lane.b32.xlu2 %v1624_v46, %s2091_s18  ;;  %v1600_v54 = vperm.slane %v1594_v44, %v2239_v57  ;;  %v1617_v7 = vrot.slane %v1612_v59, 4 }
 0x53b   :  { %v1546_v56 = vperm.slane %v1540_v53, %v2239_v57  ;;  %v1565_v43 = vrot.slane %v1550_v19, 4  ;;  %v1567_v58 = vrot.slane %v1558_v52, 4  ;;  %v1569_v25 = vrot.slane %v1562_v29, 4 }
 0x53c   :  { %v1619_v60 = vrot.slane %v1600_v54, 4  ;;  %v1618_v18 = vsel %vm219_vm8, %v1617_v7, %v1600_v54  ;;  %v2053_v54 = vld [vmem:[%s2816_s0] sm:$0xff] }
 0x53d   :  { %v1563_v63 = vrot.slane %v1546_v56, 4  ;;  %v1566_v3 = vsel %vm219_vm8, 0.0, %v1565_v43  ;;  %v1568_v0 = vsel %vm219_vm8, 0.0, %v1567_v58  ;;  %v1570_v2 = vsel %vm219_vm8, 0.0, %v1569_v25  ;;  %v2054_v58 = vld [vmem:[%s2816_s0 + $0x8] sm:$0xff]  ;;  %s2093_s0 = smov [#allocation2]  }
 0x53e   :  { %v1630_v5 = vrot.slane %v1566_v3, 4  ;;  %v1636_v6 = vsel %vm219_vm8, %v1569_v25, %v1558_v52  ;;  %v1641_v8 = vrot.slane %v1570_v2, 4  ;;  %v1620_v50 = vsel %vm219_vm8, %v1612_v59, %v1619_v60  ;;  %s1903_s4 = sshll.u32 %s2093_s0, 4  ;;  %s1904_s4 = int_to_ptr.vmem [resolvable:$true] %s1903_s4 }
 0x53f   :  { %v1640_v49 = vperm.slane %v1636_v6, %v2230_v41  ;;  %v1564_v9 = vsel %vm219_vm8, 0.0, %v1563_v63  ;;  %v1625_v13 = vsel %vm219_vm8, %v1565_v43, %v1546_v56  ;;  %1681 = vrot.lane.b32.xlu0 %v1620_v50, %s2092_s19  ;;  %v31_v50 = vld [vmem:[%s2817_s1 + $0xb0] sm:$0xff] }
 0x540   :  { %v1629_v14 = vperm.slane %v1625_v13, %v2230_v41  ;;  %v1631_v15 = vsel %vm219_vm8, %v1630_v5, %v1564_v9  ;;  %v1642_v16 = vsel %vm219_vm8, %v1641_v8, %v1568_v0  ;;  %1804 = vmatpush.msrb.mxu3 %v31_v50  ;;  %v30_v9 = vld [vmem:[%s2817_s1 + $0xa0] sm:$0xff]  ;;  %v29_v13 = vld [vmem:[%s2817_s1 + $0x90] sm:$0xff] }
 0x541   :  { %v1635_v4 = vperm.slane %v1631_v15, %v2230_v41  ;;  %v1646_v1 = vperm.slane %v1642_v16, %v2230_v41  ;;  %v1661_v36 = vrot.slane %v1640_v49, 4 }
 0x542   :  { %v1649_v61 = vrot.slane %v1629_v14, 4  ;;  %1805 = vmatpush.msrb.mxu3 %v30_v9 }
 0x543   :  { %v1662_v21 = vsel %vm219_vm8, %v1646_v1, %v1661_v36  ;;  %v1647_v11 = vrot.slane %v1635_v4, 4  ;;  %v1659_v28 = vrot.slane %v1646_v1, 4 }
 0x544   :  { %v1650_v24 = vsel %vm219_vm8, %v1635_v4, %v1649_v61  ;;  %v1670_v26 = vperm.slane %v1662_v21, %v2239_v57  ;;  %1806 = vmatpush.msrb.mxu3 %v29_v13 }
 0x545   :  { %v1648_v31 = vsel %vm219_vm8, %v1647_v11, %v1629_v14  ;;  %v1660_v23 = vsel %vm219_vm8, %v1659_v28, %v1640_v49  ;;  %v1658_v30 = vperm.slane %v1650_v24, %v2239_v57  ;;  %v28_v14 = vld [vmem:[%s2817_s1 + $0x80] sm:$0xff] }
 0x546   :  { %v1675_v27 = vrot.slane %v1670_v26, 4  ;;  %v1654_v35 = vperm.slane %v1648_v31, %v2239_v57  ;;  %v1666_v41 = vperm.slane %v1660_v23, %v2239_v57  ;;  %v27_v57 = vld [vmem:[%s2817_s1 + $0x70] sm:$0xff]  ;;  %1807 = vmatpush.msrb.mxu3 %v28_v14 }
 0x547   :  { %v1677_v32 = vrot.slane %v1658_v30, 4  ;;  %1729 = vmatpush.msrb.mxu2 %v27_v57 }
 0x548   :  { %v1676_v22 = vsel %vm219_vm8, %v1675_v27, %v1658_v30  ;;  %v1671_v37 = vrot.slane %v1666_v41, 4  ;;  %v1673_v38 = vrot.slane %v1654_v35, 4 }
 0x549   :  { %1691 = vrot.lane.b32.xlu1 %v1676_v22, %s2090_s17  ;;  %v1678_v42 = vsel %vm219_vm8, %v1670_v26, %v1677_v32  ;;  %1730 = vmatpush.msrb.mxu2 %v26_v12  ;;  %v39_v32 = vld [vmem:[%s2817_s1 + $0x120] sm:$0xff]  ;;  %v38_v12 = vld [vmem:[%s2817_s1 + $0x110] sm:$0xff] }
 0x54a   :  { %v1674_v33 = vsel %vm219_vm8, %v1666_v41, %v1673_v38  ;;  %v1672_v34 = vsel %vm219_vm8, %v1671_v37, %v1654_v35  ;;  %vm1865_vm8 = vcmask 523264  }
 0x54b   :  { %1683 = vrot.lane.b32.xlu0 %v1674_v33, %s2092_s19  ;;  %1731 = vmatpush.msrb.mxu2 %v25_v47  ;;  %v32_v33 = vld [vmem:[%s2817_s1 + $0x150] ss:$0 sm:$0xff]  ;;  %v37_v47 = vld [vmem:[%s2817_s1 + $0x100] sm:$0xff] }
 0x54d   :  { %1732 = vmatpush.msrb.mxu2 %v24_v40  ;;  %v36_v40 = vld [vmem:[%s2817_s1 + $0xf0] sm:$0xff] }
 0x553   :  { %1699 = vrot.lane.b32.xlu0 %v1678_v42, %s2091_s18 }
 0x594   :  { %v1698_v44 = vpop.permute.xlu2 %1697 }
 0x5aa   :  { %v1690_v39 = vpop.permute.xlu1 %1689 }
 0x5b1   :  { %v1682_v62 = vpop.permute.xlu0 %1681 }
 0x5b2   :  { %v1703_v45 = vsel %vm955_vm9, %v1618_v18, %v1682_v62  ;;  %v35_v62 = vld [vmem:[%s2817_s1 + $0xe0] sm:$0xff] }
 0x5b3   :  { %v1706_v20 = vsel %vm1705_vm11, %v1703_v45, %v1690_v39  ;;  %v34_v39 = vld [vmem:[%s2817_s1 + $0xd0] sm:$0xff] }
 0x5b4   :  { %v1709_v48 = vsel %vm1708_vm12, %v1706_v20, %v1698_v44 }
 0x5b5   :  { %1946 = vmatmul.msk.f32.vlgmr.msrb.gmra.mxu2 %vm45_vm0, %v1709_v48 }
 0x5bb   :  { %v1692_v19 = vpop.permute.xlu1 %1691 }
 0x5bd   :  { %v1684_v51 = vpop.permute.xlu0 %1683 }
 0x5be   :  { %v1704_v17 = vsel %vm955_vm9, %v1672_v34, %v1684_v51  ;;  %v40_v34 = vld [vmem:[%s2817_s1 + $0x130] sm:$0xff] }
 0x5bf   :  { %v1707_v29 = vsel %vm1705_vm11, %v1704_v17, %v1692_v19  ;;  %1880 = vmatpush.msra.mxu0 %v40_v34  ;;  %v33_v19 = vld [vmem:[%s2817_s1 + $0xc0] sm:$0xff] }
 0x5c1   :  { %1881 = vmatpush.msra.mxu0 %v39_v32 }
 0x5c3   :  { %1882 = vmatpush.msra.mxu0 %v38_v12 }
 0x5c5   :  { %v1700_v52 = vpop.permute.xlu0 %1699  ;;  %1883 = vmatpush.msra.mxu0 %v37_v47 }
 0x5c6   :  { %v1710_v46 = vsel %vm1708_vm12, %v1707_v29, %v1700_v52 }
 0x5c7   :  { %1947 = vmatmul.msk.f32.gmra.mxu2 %vm45_vm0, %v1710_v46  ;;  %1884 = vmatpush.msra.mxu0 %v36_v40 }
 0x5c9   :  { %1885 = vmatpush.msra.mxu0 %v35_v62 }
 0x5cb   :  { %1886 = vmatpush.msra.mxu0 %v34_v39 }
 0x5cd   :  { %1887 = vmatpush.msra.mxu0 %v33_v19 }
 0x638   :  { %v1734_v53 = vpop.f32.mrf.mxu2 }
 0x639   :  { %v2744_v55 = vadd.f32 %v2053_v54, %v1734_v53 }
 0x63b   :  { %v1742_v56 = vsel %vm45_vm0, %v2744_v55, 0.0 }
 0x63c   :  { %1743 = vadd.xlane.f32.xlu2 %v1742_v56 }
 0x64a   :  { %v1737_v43 = vpop.f32.mrf.mxu2 }
 0x64b   :  { %v2751_v25 = vadd.f32 %v2054_v58, %v1737_v43 }
 0x64d   :  { %v1745_v59 = vsel %vm45_vm0, %v2751_v25, 0.0 }
 0x64e   :  { %1746 = vadd.xlane.f32.xlu1 %v1745_v59 }
 0x6af   :  { %v1744_v60 = vpop.xlane.xlu2 %1743 }
 0x6b0   :  { %v1748_v63 = vmul.f32 %v1744_v60, %v2118_v10 }
 0x6b2   :  { %v1750_v3 = vsub.f32 %v2744_v55, %v1748_v63 }
 0x6b4   :  { %v1752_v0 = vmul.f32 %v1750_v3, %v1750_v3 }
 0x6b6   :  { %v1754_v2 = vsel %vm45_vm0, %v1752_v0, 0.0 }
 0x6b7   :  { %1755 = vadd.xlane.f32.xlu0 %v1754_v2 }
 0x6c1   :  { %v1747_v5 = vpop.xlane.xlu1 %1746 }
 0x6c2   :  { %v1749_v6 = vmul.f32 %v1747_v5, %v2118_v10 }
 0x6c4   :  { %v1751_v8 = vsub.f32 %v2751_v25, %v1749_v6 }
 0x6c6   :  { %v1753_v7 = vmul.f32 %v1751_v8, %v1751_v8 }
 0x6c8   :  { %v1757_v49 = vsel %vm45_vm0, %v1753_v7, 0.0 }
 0x6c9   :  { %1758 = vadd.xlane.f32.xlu2 %v1757_v49 }
 0x72a   :  { %v1756_v15 = vpop.xlane.xlu0 %1755 }
 0x72b   :  { %v1760_v16 = vmul.f32 %v1756_v15, %v2118_v10 }
 0x72d   :  { %v1762_v18 = vadd.f32 1e-05, %v1760_v16 }
 0x72f   :  { %2041 = vrsqrt.f32 %v1762_v18  ;;  %vm1770_vm14 = vweird.f32 %v1762_v18 }
 0x735   :  { %v2042_v4 = vpop.eup %2041 }
 0x736   :  { %v1765_v1 = vmul.f32 %v2042_v4, %v1762_v18  ;;  %vm1771_vm13 = vweird.f32 %v2042_v4 }
 0x737   :  { %vm1772_vm15 = vmor %vm1770_vm14, %vm1771_vm13 }
 0x738   :  { %v1766_v36 = vmul.f32 %v2042_v4, %v1765_v1 }
 0x73a   :  { %v1767_v61 = vmul.f32 0.5, %v1766_v36 }
 0x73c   :  { %v1759_v21 = vpop.xlane.xlu2 %1758  ;;  %v1768_v11 = vsub.f32 1.5, %v1767_v61 }
 0x73d   :  { %v1761_v28 = vmul.f32 %v1759_v21, %v2118_v10 }
 0x73e   :  { %v1769_v24 = vmul.f32 %v2042_v4, %v1768_v11 }
 0x73f   :  { %v1763_v26 = vadd.f32 1e-05, %v1761_v28 }
 0x740   :  { %v1773_v31 = vsel %vm1772_vm15, %v2042_v4, %v1769_v24 }
 0x741   :  { %2043 = vrsqrt.f32 %v1763_v26  ;;  %v1784_v23 = vmul.f32 %v1773_v31, %v1750_v3  ;;  %vm1780_vm2 = vweird.f32 %v1763_v26 }
 0x743   :  { %1948 = vmatmul.msk.f32.vlgmr.msrb.gmra.mxu3 %vm45_vm0, %v1784_v23 }
 0x747   :  { %v2044_v30 = vpop.eup %2043 }
 0x748   :  { %v1775_v27 = vmul.f32 %v2044_v30, %v1763_v26  ;;  %vm1781_vm1 = vweird.f32 %v2044_v30 }
 0x749   :  { %vm1782_vm3 = vmor %vm1780_vm2, %vm1781_vm1 }
 0x74a   :  { %v1776_v35 = vmul.f32 %v2044_v30, %v1775_v27 }
 0x74c   :  { %v1777_v41 = vmul.f32 0.5, %v1776_v35 }
 0x74e   :  { %v1778_v22 = vsub.f32 1.5, %v1777_v41 }
 0x750   :  { %v1779_v37 = vmul.f32 %v2044_v30, %v1778_v22 }
 0x752   :  { %v1783_v38 = vsel %vm1782_vm3, %v2044_v30, %v1779_v37 }
 0x753   :  { %v1785_v10 = vmul.f32 %v1783_v38, %v1751_v8 }
 0x755   :  { %1949 = vmatmul.msk.f32.gmra.mxu3 %vm45_vm0, %v1785_v10 }
 0x7c6   :  { %v1809_v42 = vpop.f32.mrf.mxu3 }
 0x7c7   :  { %v1810_v57 = vadd.f32 %v1809_v42, %v32_v33 }
 0x7c9   :  { %1857 = vrot.lane.b32.xlu1 %v1810_v57, %s2089_s16  ;;  %v1950_v20 = vmul.f32 -1.442695, %v1810_v57 }
 0x7cb   :  { %2045 = vpow2.f32 %v1950_v20 }
 0x7d1   :  { %v2046_v48 = vpop.eup %2045 }
 0x7d2   :  { %v1821_v51 = vadd.f32 1.0, %v2046_v48 }
 0x7d4   :  { %2047 = vrcp.f32 %v1821_v51  ;;  %v1834_v58 = vand.u32 2147483648, %v1821_v51  ;;  %vm1828_vm5 = vweird.f32 %v1821_v51  ;;  %v1832_v60 = vand.u32 2147483647, %v1821_v51 }
 0x7d6   :  { %v1835_v3 = vor.u32 1.1754944e-38, %v1834_v58  ;;  %vm1833_vm7 = vcmp.eq.f32.partialorder %v1832_v60, 8.507059e+37 }
 0x7d8   :  { %v1812_v45 = vpop.f32.mrf.mxu3 }
 0x7d9   :  { %v1813_v44 = vadd.f32 %v1812_v45, %v32_v33 }
 0x7da   :  { %v2048_v52 = vpop.eup %2047 }
 0x7db   :  { %1859 = vrot.lane.b32.xlu0 %v1813_v44, %s2089_s16  ;;  %v1951_v17 = vmul.f32 -1.442695, %v1813_v44  ;;  %v1824_v29 = vmul.f32 %v2048_v52, %v1821_v51  ;;  %vm1829_vm4 = vweird.f32 %v2048_v52 }
 0x7dc   :  { %vm1830_vm6 = vmor %vm1828_vm5, %vm1829_vm4 }
 0x7dd   :  { %2049 = vpow2.f32 %v1951_v17  ;;  %v1825_v54 = vsub.f32 1.0, %v1824_v29 }
 0x7df   :  { %v1826_v56 = vmul.f32 %v2048_v52, %v1825_v54 }
 0x7e1   :  { %v1827_v43 = vadd.f32 %v2048_v52, %v1826_v56 }
 0x7e3   :  { %v2050_v46 = vpop.eup %2049  ;;  %v1831_v63 = vsel %vm1830_vm6, %v2048_v52, %v1827_v43 }
 0x7e4   :  { %v1822_v53 = vadd.f32 1.0, %v2050_v46  ;;  %v1836_v2 = vsel %vm1833_vm7, %v1835_v3, %v1831_v63 }
 0x7e5   :  { %v1853_v6 = vmul.f32 %v1836_v2, %v1810_v57 }
 0x7e6   :  { %2051 = vrcp.f32 %v1822_v53  ;;  %v1849_v9 = vand.u32 2147483648, %v1822_v53  ;;  %vm1843_vm10 = vweird.f32 %v1822_v53  ;;  %v1847_v13 = vand.u32 2147483647, %v1822_v53 }
 0x7e8   :  { %v1850_v15 = vor.u32 1.1754944e-38, %v1849_v9  ;;  %vm1848_vm12 = vcmp.eq.f32.partialorder %v1847_v13, 8.507059e+37 }
 0x7ec   :  { %v2052_v59 = vpop.eup %2051 }
 0x7ed   :  { %v1839_v0 = vmul.f32 %v2052_v59, %v1822_v53  ;;  %vm1844_vm9 = vweird.f32 %v2052_v59 }
 0x7ee   :  { %vm1845_vm11 = vmor %vm1843_vm10, %vm1844_vm9 }
 0x7ef   :  { %v1840_v5 = vsub.f32 1.0, %v1839_v0 }
 0x7f1   :  { %v1841_v49 = vmul.f32 %v2052_v59, %v1840_v5 }
 0x7f3   :  { %v1842_v50 = vadd.f32 %v2052_v59, %v1841_v49 }
 0x7f5   :  { %v1846_v14 = vsel %vm1845_vm11, %v2052_v59, %v1842_v50 }
 0x7f6   :  { %v1851_v16 = vsel %vm1848_vm12, %v1850_v15, %v1846_v14 }
 0x7f7   :  { %v1854_v18 = vmul.f32 %v1851_v16, %v1813_v44 }
 0x83b   :  { %v1858_v8 = vpop.permute.xlu1 %1857 }
 0x83c   :  { %v1863_v7 = vmul.f32 %v1858_v8, %v1853_v6 }
 0x83e   :  { %1952 = vmatmul.msk.f32.vlgmr.msra.gmra.mxu0 %vm1865_vm8, %v1863_v7 }
 0x84d   :  { %v1860_v4 = vpop.permute.xlu0 %1859 }
 0x84e   :  { %v1864_v1 = vmul.f32 %v1860_v4, %v1854_v18 }
 0x850   :  { %1953 = vmatmul.msk.f32.gmra.mxu0 %vm1865_vm8, %v1864_v1 }
 0x8bb   :  { %v1889_v36 = vpop.f32.mrf.mxu0 }
 0x8bc   :  { %v1895_v61 = vadd.f32 %v1889_v36, %v2744_v55 }
 0x8be   :  { %1897 = vst.msk [vmem:[#allocation2] sm:$0xff] %vm45_vm0, %v1895_v61 }
 0x8cd   :  { %v1892_v21 = vpop.f32.mrf.mxu0 }
 0x8ce   :  { %v1896_v11 = vadd.f32 %v1892_v21, %v2751_v25 }
 0x8d0   :  { %1898 = vst.msk [vmem:[#allocation2 + $0x8] sm:$0xff] %vm45_vm0, %v1896_v11 }
 0x8d1   :  { %1911 = dma.vmem_to_hbm [thread:$0]  %s1904_s4, 256, %s1906_s3, [#allocation3], %s2094_s5, %s2094_s5, %s2092_s19  }
 0x8d2   :  { %2079 = dma.done.wait [#allocation3], 256  }
 0x8d3   :  { %2080 = vsyncadd [#allocation3], 4294967040 }
 0x8d4   :  { %1916 = vsyncpa [#allocation3], 1 }

</bundles_post_ra>
